<compile_context>
chip_gen: v5e
topology: v5e:2x2
jax: 0.10.0
libtpu: 0.0.40
codegen_flags: <defaults>
</compile_context>

<pallas_src>
import functools
import math

import jax
import jax.numpy as jnp
from jax.experimental import pallas as pl
from jax.experimental.pallas import tpu as pltpu


def _round_up(x, m):
    return ((x + m - 1) // m) * m


def lfq_kernel(x_ref, w_in_ref, b_in_ref, cb_ref, w_out_ref, b_out_ref, mask_ref,
               out_ref, idx_ref, ent_ref, prob_ref, commit_ref,
               *, codebook_scale, t_valid, apply_mask):
    # x tile is channel-major: (D, TT), tokens on the lane axis.
    x = x_ref[...]                                                      # (D, TT) f32
    tt = x.shape[1]

    # ---- in_proj (weight-norm 1x1 Conv1d == channel matmul); f32 for sign parity
    h = (jnp.dot(w_in_ref[...], x, preferred_element_type=jnp.float32)
         + b_in_ref[...])                                               # (cd, TT)

    # ---- binary (sign) quantization (forward value of the straight-through op)
    pos = (h > 0.0).astype(jnp.float32)                                 # (cd, TT)
    quantized = pos * (2.0 * codebook_scale) - codebook_scale           # +/- scale

    # ---- code indices, lane-dense (1, TT)
    # (exact in f32 for codebook_size <= 2^24)
    idx_ref[...] = jnp.sum(pos * mask_ref[...], axis=0,
                           keepdims=True).astype(jnp.int32)             # (1, TT)

    # ---- entropy-aux statistics
    # logits = 2*inv_temp * codebook @ h ; scale folded into cb_ref on the host.
    # bf16 operands (loss-only path), f32 accumulation.
    logits = jnp.dot(cb_ref[...], h.astype(jnp.bfloat16),
                     preferred_element_type=jnp.float32)                # (CS, TT)
    m = jnp.max(logits, axis=0, keepdims=True)                          # (1, TT)
    z = logits - m
    e = jnp.exp(z)
    s = jnp.sum(e, axis=0, keepdims=True)                               # (1, TT)
    p = e * (1.0 / s)                                                   # exact softmax
    # per-token entropy via logsumexp identity: H = log(s) - sum(p * z)
    ent_rows = jnp.log(s) - jnp.sum(p * z, axis=0, keepdims=True)       # (1, TT)

    # ---- commitment loss: per-token sum of squared error
    d2_rows = jnp.sum((h - quantized) ** 2, axis=0, keepdims=True)      # (1, TT)

    if apply_mask:                                                      # static: only if T was padded
        cols = (jax.lax.broadcasted_iota(jnp.int32, (1, tt), 1)
                + pl.program_id(1) * tt)
        valid = (cols < t_valid).astype(jnp.float32)                    # (1, TT)
        ent_rows = ent_rows * valid
        d2_rows = d2_rows * valid
        p = p * valid

    # ---- per-tile partial reductions (finalized in JAX glue)
    ent_ref[...] = jnp.sum(ent_rows, axis=1, keepdims=True)             # (1, 1)
    commit_ref[...] = jnp.sum(d2_rows, axis=1, keepdims=True)           # (1, 1)
    prob_ref[...] = jnp.sum(p, axis=1, keepdims=True)                   # (CS, 1)

    # ---- out_proj on quantized values; f32 for output parity
    out_ref[...] = (jnp.dot(w_out_ref[...], quantized,
                            preferred_element_type=jnp.float32)
                    + b_out_ref[...])                                   # (D, TT)


def _weight_norm(v, g):
    # PyTorch weight_norm with dim=0: w[o] = g[o] * v[o] / ||v[o]||
    nrm = jnp.sqrt(jnp.sum(v * v, axis=1, keepdims=True))
    return g[:, None] * v / nrm


def make_lfq_params(key, input_dim, codebook_size, codebook_scale=1.0):
    cd = int(math.log2(codebook_size))
    k = jax.random.split(key, 6)
    v_in = jax.random.normal(k[0], (cd, input_dim), jnp.float32) * 0.2
    g_in = 1.0 + 0.05 * jax.random.normal(k[1], (cd,), jnp.float32)
    b_in = 0.01 * jax.random.normal(k[2], (cd,), jnp.float32)
    v_out = jax.random.normal(k[3], (input_dim, cd), jnp.float32) * 0.2
    g_out = 1.0 + 0.05 * jax.random.normal(k[4], (input_dim,), jnp.float32)
    b_out = 0.01 * jax.random.normal(k[5], (input_dim,), jnp.float32)

    w_in = _weight_norm(v_in, g_in)      # (cd, input_dim)
    w_out = _weight_norm(v_out, g_out)   # (input_dim, cd)

    mask = (2 ** jnp.arange(cd - 1, -1, -1)).astype(jnp.int32)               # (cd,)
    all_codes = jnp.arange(codebook_size, dtype=jnp.int32)
    bits = ((all_codes[:, None] & mask) != 0).astype(jnp.float32)            # (CS, cd)
    codebook = bits * codebook_scale * 2.0 - codebook_scale                  # (CS, cd)

    return dict(w_in=w_in, b_in=b_in, w_out=w_out, b_out=b_out,
                mask=mask, codebook=codebook)


def lfq_forward(x_nct, params, *, codebook_scale=1.0, inv_temperature=100.0,
                entropy_loss_weight=1.0, commitment_loss_weight=1.0,
                diversity_gamma=1.0, tile_t=512):
    """LFQ forward (training-mode semantics). x_nct: (B, D, T) like Conv1d input."""
    B, D, T = x_nct.shape
    cd = params["w_in"].shape[0]
    CS = params["codebook"].shape[0]
    N = B * T

    x = x_nct.astype(jnp.float32)

    # ---- token tiling along T; data stays channel-major (no wrapper transposes)
    if T <= tile_t:
        TT = T                      # single full-extent tile along T
        T_pad = T
    else:
        TT = tile_t                 # multiple of 128 -> lane-dense stores
        T_pad = _round_up(T, TT)
        if T_pad != T:
            x = jnp.pad(x, ((0, 0), (0, 0), (0, T_pad - T)))
    num_tt = T_pad // TT
    apply_mask = (T_pad != T)

    # ---- weight prep (host, once per trace)
    w_in = params["w_in"].astype(jnp.float32)                     # (cd, D)
    b_in = params["b_in"].reshape(cd, 1).astype(jnp.float32)
    w_out = params["w_out"].astype(jnp.float32)                   # (D, cd)
    b_out = params["b_out"].reshape(D, 1).astype(jnp.float32)
    mask_col = params["mask"].astype(jnp.float32).reshape(cd, 1)
    # Fold the 2*inv_temperature logit scale into the codebook; bf16 operands
    # for the loss-only logits matmul (f32 accumulation in the kernel).
    cb_scaled = ((2.0 * float(inv_temperature))
                 * params["codebook"].astype(jnp.float32)).astype(jnp.bfloat16)  # (CS, cd)

    kern = functools.partial(
        lfq_kernel,
        codebook_scale=float(codebook_scale),
        t_valid=int(T),
        apply_mask=apply_mask)

    def const(shape):
        return pl.BlockSpec(shape, lambda b, t: (0, 0))

    # Advisory cost estimate for XLA's scheduler around the custom call.
    flops = 2 * N * cd * (2 * D + CS) + 8 * N * CS
    cost = pl.CostEstimate(
        flops=int(flops),
        transcendentals=int(N * (CS + 2)),
        bytes_accessed=int(4 * (2 * B * D * T_pad + B * T_pad)
                           + 4 * B * num_tt * (CS + 2)
                           + 4 * (2 * cd * D + 2 * cd + D + CS * cd)))

    out, idx, ent_p, prob_p, commit_p = pl.pallas_call(
        kern,
        out_shape=(
            jax.ShapeDtypeStruct((B, D, T_pad), jnp.float32),          # projected output
            jax.ShapeDtypeStruct((B, 1, T_pad), jnp.int32),            # code indices (lane-dense)
            jax.ShapeDtypeStruct((B * num_tt, 1, 1), jnp.float32),     # per-tile entropy sum
            jax.ShapeDtypeStruct((B * num_tt, CS, 1), jnp.float32),    # per-tile prob sums
            jax.ShapeDtypeStruct((B * num_tt, 1, 1), jnp.float32),     # per-tile commit SSE
        ),
        grid_spec=pltpu.PrefetchScalarGridSpec(
            num_scalar_prefetch=0,
            grid=(B, num_tt),
            in_specs=[
                pl.BlockSpec((None, D, TT), lambda b, t: (b, 0, t)),   # x tile (D, TT)
                const((cd, D)),                                        # w_in   (resident)
                const((cd, 1)),                                        # b_in
                const((CS, cd)),                                       # scaled codebook (bf16)
                const((D, cd)),                                        # w_out
                const((D, 1)),                                         # b_out
                const((cd, 1)),                                        # bit mask column
            ],
            out_specs=(
                pl.BlockSpec((None, D, TT), lambda b, t: (b, 0, t)),
                pl.BlockSpec((None, 1, TT), lambda b, t: (b, 0, t)),
                pl.BlockSpec((None, 1, 1), lambda b, t: (b * num_tt + t, 0, 0)),
                pl.BlockSpec((None, CS, 1), lambda b, t: (b * num_tt + t, 0, 0)),
                pl.BlockSpec((None, 1, 1), lambda b, t: (b * num_tt + t, 0, 0)),
            ),
        ),
        compiler_params=pltpu.CompilerParams(
            dimension_semantics=("parallel", "parallel"),
            # Re-derived for v7x's 64 MiB/TC: double-buffered (D,TT) x/out tiles,
            # resident weights, and ~4x (CS,TT) f32 softmax temporaries fit well
            # under 32 MiB at the default TT=512.
            vmem_limit_bytes=32 * 1024 * 1024),
        cost_estimate=cost,
    )(x, w_in, b_in, cb_scaled, w_out, b_out, mask_col)

    # ---- glue: slice off T padding + scalar loss finalization
    x_out = out[:, :, :T]                                              # (B, D, T)
    indices = idx[:, 0, :T]                                            # (B, T)

    per_sample_entropy = jnp.sum(ent_p) / N
    avg_prob = jnp.sum(prob_p, axis=(0, 2)) / N                        # (CS,)
    codebook_entropy = jnp.sum(-(avg_prob * jnp.log(jnp.maximum(avg_prob, 1e-5))))
    entropy_aux_loss = per_sample_entropy - diversity_gamma * codebook_entropy
    commit_loss = jnp.sum(commit_p) / (N * cd)
    aux_loss = (entropy_aux_loss * entropy_loss_weight
                + commit_loss * commitment_loss_weight)
    return x_out, indices, aux_loss


def lfq_forward_ref(x_nct, params, *, codebook_scale=1.0, inv_temperature=100.0,
                    entropy_loss_weight=1.0, commitment_loss_weight=1.0,
                    diversity_gamma=1.0):
    """Pure-JAX reference mirroring the PyTorch forward (training mode)."""
    B, D, T = x_nct.shape
    h = jnp.einsum("bdt,cd->btc", x_nct, params["w_in"]) + params["b_in"]   # (B, T, cd)
    original = h
    quantized = jnp.where(h > 0, codebook_scale, -codebook_scale)
    indices = jnp.sum((quantized > 0).astype(jnp.int32) * params["mask"], axis=-1)
    distance = -2.0 * jnp.einsum("btc,jc->btj", original, params["codebook"])
    prob = jax.nn.softmax(-distance * inv_temperature, axis=-1)
    per_sample_entropy = jnp.mean(jnp.sum(-(prob * jnp.log(jnp.clip(prob, 1e-5))), axis=-1))
    avg_prob = jnp.mean(prob, axis=(0, 1))
    codebook_entropy = jnp.sum(-(avg_prob * jnp.log(jnp.clip(avg_prob, 1e-5))))
    entropy_aux_loss = per_sample_entropy - diversity_gamma * codebook_entropy
    commit_loss = jnp.mean((original - quantized) ** 2)
    out = jnp.einsum("btc,dc->bdt", quantized, params["w_out"]) + params["b_out"][None, :, None]
    aux = entropy_aux_loss * entropy_loss_weight + commit_loss * commitment_loss_weight
    return out, indices, aux


if __name__ == "__main__":
    B, input_dim, T = 2, 32, 16
    codebook_size = 256                       # codebook_dim = 8

    key = jax.random.PRNGKey(0)
    kp, kx = jax.random.split(key)
    params = make_lfq_params(kp, input_dim, codebook_size)
    x = jax.random.normal(kx, (B, input_dim, T), jnp.float32)   # NCT, like Conv1d input

    out, indices, aux_loss = lfq_forward(x, params)
    out, indices, aux_loss = jax.block_until_ready((out, indices, aux_loss))

    # sanity check against the pure-JAX reference
    out_r, idx_r, aux_r = lfq_forward_ref(x, params)
    assert out.shape == (B, input_dim, T) and indices.shape == (B, T)
    assert bool(jnp.all(indices == idx_r))
    assert bool(jnp.allclose(out, out_r, atol=1e-4, rtol=1e-4))
    assert bool(jnp.allclose(aux_loss, aux_r, atol=2e-3, rtol=2e-3))

    print("KERNEL_OK")
</pallas_src>

<mosaic_0001>
module attributes {stable_mosaic.version = 11 : i64} {
  func.func @lfq_kernel(%arg0: i32, %arg1: i32, %arg2: memref<1x32x16xf32, #tpu.memory_space<vmem>>, %arg3: memref<8x32xf32, #tpu.memory_space<vmem>>, %arg4: memref<8x1xf32, #tpu.memory_space<vmem>>, %arg5: memref<256x8xbf16, #tpu.memory_space<vmem>>, %arg6: memref<32x8xf32, #tpu.memory_space<vmem>>, %arg7: memref<32x1xf32, #tpu.memory_space<vmem>>, %arg8: memref<8x1xf32, #tpu.memory_space<vmem>>, %arg9: memref<1x32x16xf32, #tpu.memory_space<vmem>>, %arg10: memref<1x1x16xi32, #tpu.memory_space<vmem>>, %arg11: memref<1x1x1xf32, #tpu.memory_space<vmem>>, %arg12: memref<1x256x1xf32, #tpu.memory_space<vmem>>, %arg13: memref<1x1x1xf32, #tpu.memory_space<vmem>>) attributes {dimension_semantics = [#tpu.dimension_semantics<parallel>, #tpu.dimension_semantics<parallel>], iteration_bounds = array<i64: 2, 1>, scalar_prefetch = 0 : i64, scratch_operands = 0 : i64, tpu.core_type = #tpu.core_type<tc>, window_params = [{transform_indices = @transform_0, window_bounds = array<i64: 1, 32, 16>}, {pipeline_mode = #tpu.pipeline_mode<synchronous>, transform_indices = @transform_1, window_bounds = array<i64: 8, 32>}, {pipeline_mode = #tpu.pipeline_mode<synchronous>, transform_indices = @transform_2, window_bounds = array<i64: 8, 1>}, {pipeline_mode = #tpu.pipeline_mode<synchronous>, transform_indices = @transform_3, window_bounds = array<i64: 256, 8>}, {pipeline_mode = #tpu.pipeline_mode<synchronous>, transform_indices = @transform_4, window_bounds = array<i64: 32, 8>}, {pipeline_mode = #tpu.pipeline_mode<synchronous>, transform_indices = @transform_5, window_bounds = array<i64: 32, 1>}, {pipeline_mode = #tpu.pipeline_mode<synchronous>, transform_indices = @transform_6, window_bounds = array<i64: 8, 1>}, {transform_indices = @transform_7, window_bounds = array<i64: 1, 32, 16>}, {transform_indices = @transform_8, window_bounds = array<i64: 1, 1, 16>}, {transform_indices = @transform_9, window_bounds = array<i64: 1, 1, 1>}, {transform_indices = @transform_10, window_bounds = array<i64: 1, 256, 1>}, {transform_indices = @transform_11, window_bounds = array<i64: 1, 1, 1>}]} {
    %c0 = arith.constant 0 : index
    %c0_0 = arith.constant 0 : index
    %c0_1 = arith.constant 0 : index
    %0 = vector.load %arg2[%c0, %c0_0, %c0_1] : memref<1x32x16xf32, #tpu.memory_space<vmem>>, vector<1x32x16xf32>
    %1 = vector.shape_cast %0 : vector<1x32x16xf32> to vector<32x16xf32>
    %c0_2 = arith.constant 0 : index
    %c0_3 = arith.constant 0 : index
    %2 = vector.load %arg3[%c0_2, %c0_3] : memref<8x32xf32, #tpu.memory_space<vmem>>, vector<8x32xf32>
    %cst = arith.constant dense<0.000000e+00> : vector<8x16xf32>
    %3 = tpu.matmul %2, %1, %cst {dimension_numbers = #tpu.dot_dimension_numbers<[1], [0], [0], [1], [0, 0, 1, 1], [], []>} : vector<8x32xf32>, vector<32x16xf32>, vector<8x16xf32> -> vector<8x16xf32>
    %c0_4 = arith.constant 0 : index
    %c0_5 = arith.constant 0 : index
    %4 = vector.load %arg4[%c0_4, %c0_5] : memref<8x1xf32, #tpu.memory_space<vmem>>, vector<8x1xf32>
    %5 = vector.broadcast %4 : vector<8x1xf32> to vector<8x16xf32>
    %6 = arith.addf %3, %5 : vector<8x16xf32>
    %cst_6 = arith.constant 0.000000e+00 : f32
    %7 = vector.broadcast %cst_6 : f32 to vector<8x16xf32>
    %8 = arith.cmpf ogt, %6, %7 : vector<8x16xf32>
    %9 = arith.extui %8 : vector<8x16xi1> to vector<8x16xi32>
    %10 = arith.sitofp %9 : vector<8x16xi32> to vector<8x16xf32>
    %cst_7 = arith.constant 2.000000e+00 : f32
    %11 = vector.broadcast %cst_7 : f32 to vector<8x16xf32>
    %12 = arith.mulf %10, %11 : vector<8x16xf32>
    %cst_8 = arith.constant 1.000000e+00 : f32
    %13 = vector.broadcast %cst_8 : f32 to vector<8x16xf32>
    %14 = arith.subf %12, %13 : vector<8x16xf32>
    %c0_9 = arith.constant 0 : index
    %c0_10 = arith.constant 0 : index
    %15 = vector.load %arg8[%c0_9, %c0_10] : memref<8x1xf32, #tpu.memory_space<vmem>>, vector<8x1xf32>
    %16 = vector.broadcast %15 : vector<8x1xf32> to vector<8x16xf32>
    %17 = arith.mulf %10, %16 : vector<8x16xf32>
    %cst_11 = arith.constant dense<0.000000e+00> : vector<16xf32>
    %18 = vector.multi_reduction <add>, %17, %cst_11 [0] : vector<8x16xf32> to vector<16xf32>
    %19 = vector.shape_cast %18 : vector<16xf32> to vector<1x16xf32>
    %20 = arith.fptosi %19 : vector<1x16xf32> to vector<1x16xi32>
    %c0_12 = arith.constant 0 : index
    %c0_13 = arith.constant 0 : index
    %c0_14 = arith.constant 0 : index
    %21 = vector.load %arg10[%c0_12, %c0_13, %c0_14] : memref<1x1x16xi32, #tpu.memory_space<vmem>>, vector<1x1x16xi32>
    %22 = vector.shape_cast %21 : vector<1x1x16xi32> to vector<1x16xi32>
    %23 = vector.shape_cast %20 : vector<1x16xi32> to vector<1x1x16xi32>
    tpu.vector_store %arg10[%c0_12, %c0_13, %c0_14], %23 {strides = array<i32>} : memref<1x1x16xi32, #tpu.memory_space<vmem>>, vector<1x1x16xi32>,
    %c0_15 = arith.constant 0 : index
    %c0_16 = arith.constant 0 : index
    %24 = vector.load %arg5[%c0_15, %c0_16] : memref<256x8xbf16, #tpu.memory_space<vmem>>, vector<256x8xbf16>
    %25 = arith.truncf %6 : vector<8x16xf32> to vector<8x16xbf16>
    %cst_17 = arith.constant dense<0.000000e+00> : vector<256x16xf32>
    %26 = tpu.matmul %24, %25, %cst_17 {dimension_numbers = #tpu.dot_dimension_numbers<[1], [0], [0], [1], [0, 0, 1, 1], [], []>} : vector<256x8xbf16>, vector<8x16xbf16>, vector<256x16xf32> -> vector<256x16xf32>
    %cst_18 = arith.constant dense<0xFF800000> : vector<16xf32>
    %27 = vector.multi_reduction <maximumf>, %26, %cst_18 [0] : vector<256x16xf32> to vector<16xf32>
    %28 = vector.shape_cast %27 : vector<16xf32> to vector<1x16xf32>
    %29 = vector.broadcast %28 : vector<1x16xf32> to vector<256x16xf32>
    %30 = arith.subf %26, %29 : vector<256x16xf32>
    %31 = math.exp %30 : vector<256x16xf32>
    %cst_19 = arith.constant dense<0.000000e+00> : vector<16xf32>
    %32 = vector.multi_reduction <add>, %31, %cst_19 [0] : vector<256x16xf32> to vector<16xf32>
    %33 = vector.shape_cast %32 : vector<16xf32> to vector<1x16xf32>
    %cst_20 = arith.constant 1.000000e+00 : f32
    %34 = vector.broadcast %cst_20 : f32 to vector<1x16xf32>
    %35 = arith.divf %34, %33 : vector<1x16xf32>
    %36 = vector.broadcast %35 : vector<1x16xf32> to vector<256x16xf32>
    %37 = arith.mulf %31, %36 : vector<256x16xf32>
    %38 = math.log %33 : vector<1x16xf32>
    %39 = arith.mulf %37, %30 : vector<256x16xf32>
    %cst_21 = arith.constant dense<0.000000e+00> : vector<16xf32>
    %40 = vector.multi_reduction <add>, %39, %cst_21 [0] : vector<256x16xf32> to vector<16xf32>
    %41 = vector.shape_cast %40 : vector<16xf32> to vector<1x16xf32>
    %42 = arith.subf %38, %41 : vector<1x16xf32>
    %43 = arith.subf %6, %14 : vector<8x16xf32>
    %44 = arith.mulf %43, %43 : vector<8x16xf32>
    %cst_22 = arith.constant dense<0.000000e+00> : vector<16xf32>
    %45 = vector.multi_reduction <add>, %44, %cst_22 [0] : vector<8x16xf32> to vector<16xf32>
    %46 = vector.shape_cast %45 : vector<16xf32> to vector<1x16xf32>
    %cst_23 = arith.constant dense<0.000000e+00> : vector<1xf32>
    %47 = vector.multi_reduction <add>, %42, %cst_23 [1] : vector<1x16xf32> to vector<1xf32>
    %48 = vector.shape_cast %47 : vector<1xf32> to vector<1x1xf32>
    %c0_24 = arith.constant 0 : index
    %c0_25 = arith.constant 0 : index
    %c0_26 = arith.constant 0 : index
    %49 = vector.load %arg11[%c0_24, %c0_25, %c0_26] : memref<1x1x1xf32, #tpu.memory_space<vmem>>, vector<1x1x1xf32>
    %50 = vector.shape_cast %49 : vector<1x1x1xf32> to vector<1x1xf32>
    %51 = vector.shape_cast %48 : vector<1x1xf32> to vector<1x1x1xf32>
    tpu.vector_store %arg11[%c0_24, %c0_25, %c0_26], %51 {strides = array<i32>} : memref<1x1x1xf32, #tpu.memory_space<vmem>>, vector<1x1x1xf32>,
    %cst_27 = arith.constant dense<0.000000e+00> : vector<1xf32>
    %52 = vector.multi_reduction <add>, %46, %cst_27 [1] : vector<1x16xf32> to vector<1xf32>
    %53 = vector.shape_cast %52 : vector<1xf32> to vector<1x1xf32>
    %c0_28 = arith.constant 0 : index
    %c0_29 = arith.constant 0 : index
    %c0_30 = arith.constant 0 : index
    %54 = vector.load %arg13[%c0_28, %c0_29, %c0_30] : memref<1x1x1xf32, #tpu.memory_space<vmem>>, vector<1x1x1xf32>
    %55 = vector.shape_cast %54 : vector<1x1x1xf32> to vector<1x1xf32>
    %56 = vector.shape_cast %53 : vector<1x1xf32> to vector<1x1x1xf32>
    tpu.vector_store %arg13[%c0_28, %c0_29, %c0_30], %56 {strides = array<i32>} : memref<1x1x1xf32, #tpu.memory_space<vmem>>, vector<1x1x1xf32>,
    %cst_31 = arith.constant dense<0.000000e+00> : vector<256xf32>
    %57 = vector.multi_reduction <add>, %37, %cst_31 [1] : vector<256x16xf32> to vector<256xf32>
    %58 = vector.shape_cast %57 : vector<256xf32> to vector<256x1xf32>
    %c0_32 = arith.constant 0 : index
    %c0_33 = arith.constant 0 : index
    %c0_34 = arith.constant 0 : index
    %59 = vector.load %arg12[%c0_32, %c0_33, %c0_34] : memref<1x256x1xf32, #tpu.memory_space<vmem>>, vector<1x256x1xf32>
    %60 = vector.shape_cast %59 : vector<1x256x1xf32> to vector<256x1xf32>
    %61 = vector.shape_cast %58 : vector<256x1xf32> to vector<1x256x1xf32>
    tpu.vector_store %arg12[%c0_32, %c0_33, %c0_34], %61 {strides = array<i32>} : memref<1x256x1xf32, #tpu.memory_space<vmem>>, vector<1x256x1xf32>,
    %c0_35 = arith.constant 0 : index
    %c0_36 = arith.constant 0 : index
    %62 = vector.load %arg6[%c0_35, %c0_36] : memref<32x8xf32, #tpu.memory_space<vmem>>, vector<32x8xf32>
    %cst_37 = arith.constant dense<0.000000e+00> : vector<32x16xf32>
    %63 = tpu.matmul %62, %14, %cst_37 {dimension_numbers = #tpu.dot_dimension_numbers<[1], [0], [0], [1], [0, 0, 1, 1], [], []>} : vector<32x8xf32>, vector<8x16xf32>, vector<32x16xf32> -> vector<32x16xf32>
    %c0_38 = arith.constant 0 : index
    %c0_39 = arith.constant 0 : index
    %64 = vector.load %arg7[%c0_38, %c0_39] : memref<32x1xf32, #tpu.memory_space<vmem>>, vector<32x1xf32>
    %65 = vector.broadcast %64 : vector<32x1xf32> to vector<32x16xf32>
    %66 = arith.addf %63, %65 : vector<32x16xf32>
    %c0_40 = arith.constant 0 : index
    %c0_41 = arith.constant 0 : index
    %c0_42 = arith.constant 0 : index
    %67 = vector.load %arg9[%c0_40, %c0_41, %c0_42] : memref<1x32x16xf32, #tpu.memory_space<vmem>>, vector<1x32x16xf32>
    %68 = vector.shape_cast %67 : vector<1x32x16xf32> to vector<32x16xf32>
    %69 = vector.shape_cast %66 : vector<32x16xf32> to vector<1x32x16xf32>
    tpu.vector_store %arg9[%c0_40, %c0_41, %c0_42], %69 {strides = array<i32>} : memref<1x32x16xf32, #tpu.memory_space<vmem>>, vector<1x32x16xf32>,
    return
  }
  func.func @transform_0(%arg0: i32, %arg1: i32) -> (i32, i32, i32) {
    %c0_i32 = arith.constant 0 : i32
    %c0_i32_0 = arith.constant 0 : i32
    return %arg0, %c0_i32, %arg1 : i32, i32, i32
  }
  func.func @transform_1(%arg0: i32, %arg1: i32) -> (i32, i32) {
    %c0_i32 = arith.constant 0 : i32
    %c0_i32_0 = arith.constant 0 : i32
    %c0_i32_1 = arith.constant 0 : i32
    return %c0_i32, %c0_i32_0 : i32, i32
  }
  func.func @transform_2(%arg0: i32, %arg1: i32) -> (i32, i32) {
    %c0_i32 = arith.constant 0 : i32
    %c0_i32_0 = arith.constant 0 : i32
    %c0_i32_1 = arith.constant 0 : i32
    return %c0_i32, %c0_i32_0 : i32, i32
  }
  func.func @transform_3(%arg0: i32, %arg1: i32) -> (i32, i32) {
    %c0_i32 = arith.constant 0 : i32
    %c0_i32_0 = arith.constant 0 : i32
    %c0_i32_1 = arith.constant 0 : i32
    return %c0_i32, %c0_i32_0 : i32, i32
  }
  func.func @transform_4(%arg0: i32, %arg1: i32) -> (i32, i32) {
    %c0_i32 = arith.constant 0 : i32
    %c0_i32_0 = arith.constant 0 : i32
    %c0_i32_1 = arith.constant 0 : i32
    return %c0_i32, %c0_i32_0 : i32, i32
  }
  func.func @transform_5(%arg0: i32, %arg1: i32) -> (i32, i32) {
    %c0_i32 = arith.constant 0 : i32
    %c0_i32_0 = arith.constant 0 : i32
    %c0_i32_1 = arith.constant 0 : i32
    return %c0_i32, %c0_i32_0 : i32, i32
  }
  func.func @transform_6(%arg0: i32, %arg1: i32) -> (i32, i32) {
    %c0_i32 = arith.constant 0 : i32
    %c0_i32_0 = arith.constant 0 : i32
    %c0_i32_1 = arith.constant 0 : i32
    return %c0_i32, %c0_i32_0 : i32, i32
  }
  func.func @transform_7(%arg0: i32, %arg1: i32) -> (i32, i32, i32) {
    %c0_i32 = arith.constant 0 : i32
    %c0_i32_0 = arith.constant 0 : i32
    return %arg0, %c0_i32, %arg1 : i32, i32, i32
  }
  func.func @transform_8(%arg0: i32, %arg1: i32) -> (i32, i32, i32) {
    %c0_i32 = arith.constant 0 : i32
    %c0_i32_0 = arith.constant 0 : i32
    return %arg0, %c0_i32, %arg1 : i32, i32, i32
  }
  func.func @transform_9(%arg0: i32, %arg1: i32) -> (i32, i32, i32) {
    %c1_i32 = arith.constant 1 : i32
    %0 = arith.muli %arg0, %c1_i32 : i32
    %1 = arith.addi %0, %arg1 : i32
    %c0_i32 = arith.constant 0 : i32
    %c0_i32_0 = arith.constant 0 : i32
    %c0_i32_1 = arith.constant 0 : i32
    return %1, %c0_i32, %c0_i32_0 : i32, i32, i32
  }
  func.func @transform_10(%arg0: i32, %arg1: i32) -> (i32, i32, i32) {
    %c1_i32 = arith.constant 1 : i32
    %0 = arith.muli %arg0, %c1_i32 : i32
    %1 = arith.addi %0, %arg1 : i32
    %c0_i32 = arith.constant 0 : i32
    %c0_i32_0 = arith.constant 0 : i32
    %c0_i32_1 = arith.constant 0 : i32
    return %1, %c0_i32, %c0_i32_0 : i32, i32, i32
  }
  func.func @transform_11(%arg0: i32, %arg1: i32) -> (i32, i32, i32) {
    %c1_i32 = arith.constant 1 : i32
    %0 = arith.muli %arg0, %c1_i32 : i32
    %1 = arith.addi %0, %arg1 : i32
    %c0_i32 = arith.constant 0 : i32
    %c0_i32_0 = arith.constant 0 : i32
    %c0_i32_1 = arith.constant 0 : i32
    return %1, %c0_i32, %c0_i32_0 : i32, i32, i32
  }
}

</mosaic_0001>

<bundles_post_ra>
// kernel: tpu_custom_call.1
= control target key start
LH: loop header
LB: loop body
LE: loop exit
PB: predicated region body
PF: predicated region fallthrough
CT: control target
= control target key end

     0   :  { %s2945_s0 = inlined_call_operand.vmem [shape: f32[2,32,16], index: 0, kind: input, shape index: {}]   ;;  %s2946_s1 = inlined_call_operand.vmem [shape: f32[8,32], index: 1, kind: input, shape index: {}]   ;;  %s2947_s2 = inlined_call_operand.vmem [shape: f32[8,1], index: 2, kind: input, shape index: {}]   ;;  %s2948_s3 = inlined_call_operand.vmem [shape: bf16[256,8], index: 3, kind: input, shape index: {}]   ;;  %s2949_s4 = inlined_call_operand.vmem [shape: f32[32,8], index: 4, kind: input, shape index: {}]   ;;  %s2950_s5 = inlined_call_operand.vmem [shape: f32[32,1], index: 5, kind: input, shape index: {}]   ;;  %s2951_s6 = inlined_call_operand.vmem [shape: f32[8,1], index: 6, kind: input, shape index: {}]   ;;  %s2952_s7 = inlined_call_operand.vmem [shape: f32[2,32,16], index: 7, kind: output, shape index: {0}]   ;;  %s2953_s8 = inlined_call_operand.hbm [shape: s32[2,1,16], index: 8, kind: output, shape index: {1}]   ;;  %s2954_s9 = inlined_call_operand.vmem [shape: f32[2,1,1], index: 9, kind: output, shape index: {2}]   ;;  %s2955_s10 = inlined_call_operand.vmem [shape: f32[2,256,1], index: 10, kind: output, shape index: {3}]   ;;  %s2956_s11 = inlined_call_operand.vmem [shape: f32[2,1,1], index: 11, kind: output, shape index: {4}]  }
   0x1   :  { %2975 = sst [smem:[#allocation22_spill]] %s2945_s0 }
   0x2   :  { %2976 = sst [smem:[#allocation23_spill]] %s2946_s1 }
   0x3   :  { %2977 = sst [smem:[#allocation24_spill]] %s2947_s2 }
   0x4   :  { %17 = vsyncpa [#allocation3], 0 }
   0x5   :  { %19 = vsyncpa [#allocation3 + $0x1], 0  ;;  %s2012_s17 = smov 0   ;;  %s2014_s18 = smov 0  }
   0x6   :  { %s2016_s19 = smov 0   ;;  %s2018_s20 = smov 0  }
   0x7   :  { %s2020_s21 = smov 0   ;;  %s2022_s22 = smov 0  }
   0x8 LB: > { %s1615_s23 = sadd.s32 4294967295, %s1948_s22   ;;  %s1616_s24 = sadd.s32 4294967294, %s1948_s22   ;;  %s1948_s22 = sphi %s2022_s22, %s25_s22   ;;  %s1944_s21 = sphi %s2020_s21, %s3023_s21   ;;  %s1940_s20 = sphi %s2018_s20, %s3022_s20   ;;  %s1936_s19 = sphi %s2016_s19, %s3021_s19   ;;  %s1932_s18 = sphi %s2014_s18, %s3020_s18   ;;  %s1928_s17 = sphi %s2012_s17, %s3019_s17  }
   0x9   : > { %s37_s25 = sadd.s32 1, %s1944_s21  ;;  %s228_s26 = sadd.s32 1, %s1936_s19 }
   0xa   : > { %p39_p0 = scmp.ge.s32.totalorder %s37_s25, 2  ;;  %p238_p1 = scmp.ne.s32.totalorder %s1936_s19, %s1932_s18 }
   0xb   : > { %p239_p2 = scmp.eq.s32.totalorder %s1615_s23, 1  ;;  %p244_p3 = scmp.ne.s32.totalorder %s1932_s18, %s1928_s17 }
   0xc   : > { %s3025_s25 = smov (%p39_p0, %s37_s25), 0  ;;  %p245_p5 = scmp.eq.s32.totalorder %s1616_s24, 1 }
   0xd   : > { %p2052_p4 = por %p239_p2, %p238_p1  ;;  %s223_s28 = ssub.s32 %s1944_s21, %s3025_s25 }
   0xe   : > { %p1619_p6 = scmp.ge.s32.totalorder %s1948_s22, 1  ;;  %p226_p7 = scmp.eq.s32.totalorder %s223_s28, 0 }
   0xf   : > { %p2059_p8 = por %p245_p5, %p244_p3  ;;  %p376_p9 = scmp.lt.s32.totalorder %s1948_s22, 3 }
  0x10   : > { %s2065_s30 = scalar_select %p226_p7, %s1936_s19, %s228_s26  }
  0x11   : > { %p377_p10 = pnand %p1619_p6, %p376_p9 }
  0x13   : > { %380 = sbr.rel (%p377_p10) target bundleno = 720 (0x2d0), region = 48 }
  0x18   : > { %s2980_s2 = sld [smem:[#allocation24_spill]]  ;;  %p440_p11 = scmp.lt.s32.totalorder %s1940_s20, 1  ;;  %v1950_v1 = vmov 0   ;;  %v514_v4 = vld [vmem:[%s2951_s6] sm:$0xff]  ;;  %vm485_vm0 = vcmask 261120   ;;  %v1324_v8 = vld [vmem:[%s2950_s5 + $0x8] sm:$0xff] }
  0x19   : > { %1799 = vset.pattern.permute.xlu0 %v1950_v1  ;;  %1801 = vset.pattern.permute.xlu1 %v1950_v1  ;;  %s2981_s0 = sld [smem:[#allocation22_spill]]  ;;  %v1326_v9 = vld [vmem:[%s2950_s5 + $0x18] sm:$0xff]  ;;  %v1325_v10 = vld [vmem:[%s2950_s5 + $0x10] sm:$0xff]  ;;  %vm694_vm1 = vcmask 1043456   ;;  %v1951_v16 = vmov 0.0   ;;  %vm521_vm3 = vcmask 130048  }
  0x1a   : > { %s2072_s14 = scalar_select %p440_p11, %s1940_s20, 1  ;;  %1800 = vset.pattern.permute.xlu2 %v1950_v1  ;;  %1339 = vperm.xlu1 %1801, %v1325_v10   ;;  %v1718_v19 = vld [vmem:[%s2948_s3] sm:$0xff]  ;;  %vm645_vm4 = vcmask 64512   ;;  %v1727_v23 = vld [vmem:[%s2948_s3 + $0x48] sm:$0xff]  ;;  %v1729_v24 = vld [vmem:[%s2948_s3 + $0x58] sm:$0xff]  ;;  %vm530_vm6 = vcmask 122880  }
  0x1b   : > { %s2982_s1 = sld [smem:[#allocation23_spill]]  ;;  %v1722_v20 = vld [vmem:[%s2948_s3 + $0x20] sm:$0xff]  ;;  %v1719_v38 = vld [vmem:[%s2948_s3 + $0x8] sm:$0xff]  ;;  %v1728_v41 = vld [vmem:[%s2948_s3 + $0x50] sm:$0xff]  ;;  %s2958_s12 = sand.u32 1, %s1932_s18   ;;  %vm1184_vm7 = vcmask 0  }
  0x1c   : > { %s2957_s15 = sshll.u32 %s2072_s14, 5  ;;  %v1723_v39 = vld [vmem:[%s2948_s3 + $0x28] sm:$0xff]  ;;  %v1730_v42 = vld [vmem:[%s2948_s3 + $0x60] sm:$0xff]  ;;  %v1720_v51 = vld [vmem:[%s2948_s3 + $0x10] sm:$0xff]  ;;  %s471_s28 = scalar_lea.vmem %s2956_s11, %s2072_s14 }
  0x1d   : > { %v1724_v52 = vld [vmem:[%s2948_s3 + $0x30] sm:$0xff]  ;;  %v1731_v53 = vld [vmem:[%s2948_s3 + $0x68] sm:$0xff]  ;;  %v1319_v54 = vld [vmem:[%s2949_s4] sm:$0xff]  ;;  %s3018_s13 = sand.u32 1, %s1932_s18  }
  0x1e   : > { %v479_v0 = vld [vmem:[%s2980_s2] sm:$0xff]  ;;  %v1320_v55 = vld [vmem:[%s2949_s4 + $0x8] sm:$0xff]  ;;  %v1721_v56 = vld [vmem:[%s2948_s3 + $0x18] sm:$0xff]  ;;  %s1401_s16 = scalar_lea.sflag [#allocation3], %s3018_s13 }
  0x1f   : > { %482 = vperm.xlu0 %1799, %v479_v0   ;;  %s447_s24 = scalar_lea.vmem %s2981_s0, %s2957_s15  ;;  %s2133_s15 = scalar_lea.vmem [#allocation2], %s2958_s12  ;;  %v1725_v57 = vld [vmem:[%s2948_s3 + $0x38] sm:$0xff]  ;;  %v1732_v58 = vld [vmem:[%s2948_s3 + $0x70] sm:$0xff]  ;;  %v1726_v61 = vld [vmem:[%s2948_s3 + $0x40] sm:$0xff] }
  0x20   : > { %v477_v2 = vld [vmem:[%s447_s24 + $0x18] sm:$0xff]  ;;  %v476_v3 = vld [vmem:[%s447_s24 + $0x10] sm:$0xff]  ;;  %v475_v5 = vld [vmem:[%s447_s24 + $0x8] sm:$0xff]  ;;  %s1890_s12 = scalar_lea.hbm %s2953_s8, 2 }
  0x21   : > { %501 = vmatpush.msra.mxu0 %v477_v2  ;;  %v474_v6 = vld [vmem:[%s447_s24] sm:$0xff]  ;;  %v1321_v59 = vld [vmem:[%s2949_s4 + $0x10] sm:$0xff]  ;;  %v1322_v60 = vld [vmem:[%s2949_s4 + $0x18] sm:$0xff]  ;;  %s2984_s24 = sshll.u32 %s2072_s14, 5 }
  0x22   : > { %v478_v7 = vld [vmem:[%s2982_s1] sm:$0xff]  ;;  %v1733_v62 = vld [vmem:[%s2948_s3 + $0x78] sm:$0xff]  ;;  %s2238_s23 = scalar_lea.vmem %s2952_s7, %s2984_s24  ;;  %s1427_s1 = scalar_lea.hbm %s2953_s8, %s1940_s20 }
  0x23   : > { %502 = vmatpush.msra.mxu0 %v476_v3  ;;  %s1431_s24 = sshll.u32 %s1427_s1, 4  ;;  %s1432_s24 = int_to_ptr.hbm [resolvable:$true] %s1431_s24 }
  0x25   : > { %503 = vmatpush.msra.mxu0 %v475_v5 }
  0x27   : > { %517 = vperm.xlu0 %1799, %v514_v4   ;;  %504 = vmatpush.msra.mxu0 %v474_v6 }
  0x28   : > { %1626 = vmatmul.msk.f32.vlgmr.msra.gmra.mxu0 %vm485_vm0, %v478_v7 }
  0x2f   : > { %1334 = vperm.xlu0 %1799, %v1324_v8  }
  0x37   : > { %1344 = vperm.xlu0 %1799, %v1326_v9  }
  0x8c   : > { %v1340_v63 = vpop.permute.xlu1 %1339 }
  0x91   : > { %v483_v11 = vpop.permute.xlu0 %482 }
  0x99   : > { %v518_v15 = vpop.permute.xlu0 %517 }
  0xa5   : > { %v506_v12 = vpop.f32.mrf.mxu0 }
  0xa6   : > { %v507_v13 = vadd.f32 %v506_v12, %v483_v11 }
  0xa8   : > { %v564_v14 = vpack.c.bf16 %v507_v13, %v507_v13  ;;  %vm509_vm2 = vcmp.gt.f32.partialorder %v507_v13, 0.0 }
  0xa9   : > { %v1627_v17 = vsel %vm509_vm2, 1.0, %v1951_v16 }
  0xaa   : > { %v696_v18 = vsel %vm694_vm1, %v564_v14, 0  ;;  %v512_v21 = vmul.f32 2.0, %v1627_v17  ;;  %v520_v22 = vmul.f32 %v1627_v17, %v518_v15 }
  0xab   : > { %705 = vmatpush.bf16.msrb.mxu0 %v696_v18  ;;  %1734 = vmatpush.bf16.msra.mxu1 %v696_v18 }
  0xac   : > { %1735 = vmatpush.bf16.msra.mxu2 %v696_v18  ;;  %1736 = vmatpush.bf16.msra.mxu3 %v696_v18  ;;  %v1628_v25 = vadd.f32 -1.0, %v512_v21  ;;  %v522_v26 = vsel %vm521_vm3, %v520_v22, 0.0 }
  0xad   : > { %v523_v27 = vrot.slane %v522_v26, 4 }
  0xae   : > { %1693 = vmatmul.msk.bf16.vlgmr.msrb.gmra.mxu0 %vm645_vm4, %v1718_v19  ;;  %1697 = vmatmul.msk.bf16.vlgmr.msra.gmra.mxu1 %vm645_vm4, %v1722_v20  ;;  %v1172_v28 = vsub.f32 %v507_v13, %v1628_v25 }
  0xaf   : > { %1702 = vmatmul.msk.bf16.vlgmr.msra.gmra.mxu2 %vm645_vm4, %v1727_v23  ;;  %1704 = vmatmul.msk.bf16.vlgmr.msra.gmra.mxu3 %vm645_vm4, %v1729_v24  ;;  %v524_v29 = vadd.f32 %v523_v27, %v522_v26  ;;  %v1335_v23 = vpop.permute.xlu0 %1334 }
  0xb0   : > { %v1173_v30 = vmul.f32 %v1172_v28, %v1172_v28  ;;  %1374 = vmatpush.msrb.mxu2 %v1628_v25 }
  0xb1   : > { %v525_v32 = vrot.slane %v524_v29, 2 }
  0xb2   : > { %v1174_v31 = vsel %vm521_vm3, %v1173_v30, 0.0 }
  0xb3   : > { %v1175_v33 = vrot.slane %v1174_v31, 4  ;;  %v526_v35 = vadd.f32 %v525_v32, %v524_v29 }
  0xb5   : > { %v1176_v34 = vadd.f32 %v1175_v33, %v1174_v31  ;;  %v527_v40 = vrot.slane %v526_v35, 1 }
  0xb7   : > { %v1177_v36 = vrot.slane %v1176_v34, 2  ;;  %v528_v45 = vadd.f32 %v527_v40, %v526_v35 }
  0xb9   : > { %v1178_v37 = vadd.f32 %v1177_v36, %v1176_v34  ;;  %vm1737_vm5 = vcmp.lt.s32.totalorder %v528_v45, 0  ;;  %v1738_v47 = vceil.f32 %v528_v45  ;;  %v1739_v48 = vfloor.f32 %v528_v45  ;;  %v1345_v45 = vpop.permute.xlu0 %1344 }
  0xbb   : > { %v1179_v43 = vrot.slane %v1178_v37, 1  ;;  %v1740_v49 = vsel %vm1737_vm5, %v1738_v47, %v1739_v48 }
  0xbc   : > { %v1741_v50 = vcvt.f32.s32 %v1740_v49 }
  0xbd   : > { %v1180_v44 = vadd.f32 %v1179_v43, %v1178_v37 }
  0xbe   : > { %1694 = vmatmul.msk.bf16.gmra.mxu0 %vm645_vm4, %v1719_v38  ;;  %1698 = vmatmul.msk.bf16.gmra.mxu1 %vm645_vm4, %v1723_v39  ;;  %531 = vst.msk [vmem:[%s2133_s15] sm:$0x1] %vm530_vm6, %v1741_v50 }
  0xbf   : > { %1703 = vmatmul.msk.bf16.gmra.mxu2 %vm645_vm4, %v1728_v41  ;;  %1705 = vmatmul.msk.bf16.gmra.mxu3 %vm645_vm4, %v1730_v42  ;;  %v1186_v46 = vsel %vm521_vm3, %v1180_v44, 0.0 }
  0xc0   : > { %1187 = vadd.xlane.f32.xlu1 %v1186_v46 }
  0xce   : > { %1695 = vmatmul.msk.bf16.gmra.mxu0 %vm645_vm4, %v1720_v51  ;;  %1699 = vmatmul.msk.bf16.gmra.mxu1 %vm645_vm4, %v1724_v52 }
  0xcf   : > { %1706 = vmatmul.msk.bf16.gmra.mxu3 %vm645_vm4, %v1731_v53  ;;  %1709 = vmatmul.msk.f32.vlgmr.msrb.gmra.mxu2 %vm645_vm4, %v1319_v54 }
  0xd7   : > { %1710 = vmatmul.msk.f32.gmra.mxu2 %vm645_vm4, %v1320_v55 }
  0xde   : > { %1696 = vmatmul.msk.bf16.gmra.mxu0 %vm645_vm4, %v1721_v56  ;;  %1700 = vmatmul.msk.bf16.gmra.mxu1 %vm645_vm4, %v1725_v57 }
  0xdf   : > { %1707 = vmatmul.msk.bf16.gmra.mxu3 %vm645_vm4, %v1732_v58  ;;  %1711 = vmatmul.msk.f32.gmra.mxu2 %vm645_vm4, %v1321_v59 }
  0xe7   : > { %1712 = vmatmul.msk.f32.gmra.mxu2 %vm645_vm4, %v1322_v60 }
  0xee   : > { %1701 = vmatmul.msk.bf16.gmra.mxu1 %vm645_vm4, %v1726_v61 }
  0xef   : > { %1708 = vmatmul.msk.bf16.gmra.mxu3 %vm645_vm4, %v1733_v62 }
 0x12b   : > { %v2184_v0 = vpop.f32.mrf.mxu0  ;;  %v2186_v1 = vpop.f32.mrf.mxu1 }
 0x12c   : > { %v787_v36 = vsel %vm521_vm3, %v2184_v0, -inf  ;;  %v799_v43 = vsel %vm521_vm3, %v2186_v1, -inf }
 0x132   : > { %v2188_v2 = vpop.f32.mrf.mxu2  ;;  %v2190_v3 = vpop.f32.mrf.mxu3 }
 0x133   : > { %v2196_v4 = vpop.f32.mrf.mxu0  ;;  %v2198_v5 = vpop.f32.mrf.mxu1 }
 0x134   : > { %v1188_v6 = vpop.xlane.xlu1 %1187  ;;  %v788_v49 = vsel %vm521_vm3, %v2196_v4, -inf  ;;  %v801_v62 = vsel %vm521_vm3, %v2198_v5, -inf }
 0x135   : > { %1189 = vst.msk [vmem:[%s471_s28] sm:$0x1] %vm1184_vm7, %v1188_v6  ;;  %s1429_s28 = sshll.u32 %s2133_s15, 4  ;;  %s1430_s28 = int_to_ptr.vmem [resolvable:$true] %s1429_s28 }
 0x13a   : > { %v2201_v7 = vpop.f32.mrf.mxu2  ;;  %v2203_v8 = vpop.f32.mrf.mxu3 }
 0x13b   : > { %v2205_v9 = vpop.f32.mrf.mxu0  ;;  %v2207_v10 = vpop.f32.mrf.mxu1 }
 0x13c   : > { %v789_v38 = vsel %vm521_vm3, %v2205_v9, -inf  ;;  %v803_v46 = vsel %vm521_vm3, %v2207_v10, -inf }
 0x142   : > { %v2209_v11 = vpop.f32.mrf.mxu2  ;;  %v2211_v12 = vpop.f32.mrf.mxu3 }
 0x143   : > { %v2213_v13 = vpop.f32.mrf.mxu0  ;;  %v2215_v14 = vpop.f32.mrf.mxu1 }
 0x144   : > { %v790_v39 = vsel %vm521_vm3, %v2213_v13, -inf  ;;  %v805_v47 = vsel %vm521_vm3, %v2215_v14, -inf }
 0x14a   : > { %v2217_v15 = vpop.f32.mrf.mxu2  ;;  %v2219_v16 = vpop.f32.mrf.mxu3 }
 0x14b   : > { %v2221_v17 = vpop.f32.mrf.mxu0  ;;  %v2223_v18 = vpop.f32.mrf.mxu1 }
 0x14c   : > { %v791_v29 = vsel %vm521_vm3, %v2221_v17, -inf  ;;  %v807_v57 = vsel %vm521_vm3, %v2223_v18, -inf }
 0x14d   : > { %v792_v40 = vmax.f32 %v787_v36, %v791_v29  ;;  %v819_v29 = vsel %vm521_vm3, %v2188_v2, -inf }
 0x14f   : > { %v800_v48 = vmax.f32 %v792_v40, %v799_v43  ;;  %v829_v43 = vsel %vm521_vm3, %v2203_v8, -inf }
 0x151   : > { %v808_v59 = vmax.f32 %v800_v48, %v807_v57 }
 0x152   : > { %v2225_v19 = vpop.f32.mrf.mxu3  ;;  %v2227_v20 = vpop.f32.mrf.mxu2 }
 0x153   : > { %2983 = vst [vmem:[#allocation5_spill] sm:$0xff] %v2227_v20  ;;  %v2229_v21 = vpop.f32.mrf.mxu0  ;;  %v2231_v22 = vpop.f32.mrf.mxu1 }
 0x154   : > { %v793_v44 = vsel %vm521_vm3, %v2229_v21, -inf }
 0x155   : > { %v794_v54 = vmax.f32 %v788_v49, %v793_v44 }
 0x15a   : > { %v2240_v24 = vpop.f32.mrf.mxu3  ;;  %v1379_v25 = vpop.f32.mrf.mxu2 }
 0x15b   : > { %v1380_v26 = vadd.f32 %v1379_v25, %v1335_v23  ;;  %v2242_v27 = vpop.f32.mrf.mxu0  ;;  %v2244_v28 = vpop.f32.mrf.mxu1  ;;  %v802_v23 = vmax.f32 %v794_v54, %v801_v62  ;;  %v837_v54 = vsel %vm521_vm3, %v2240_v24, -inf }
 0x15c   : > { %v795_v32 = vsel %vm521_vm3, %v2242_v27, -inf  ;;  %v811_v60 = vsel %vm521_vm3, %v2244_v28, -inf }
 0x15d   : > { %1389 = vst.msk [vmem:[%s2238_s23 + $0x8] sm:$0xff] %vm521_vm3, %v1380_v26  ;;  %v796_v41 = vmax.f32 %v789_v38, %v795_v32  ;;  %v823_v26 = vsel %vm521_vm3, %v2209_v11, -inf  ;;  %v809_v32 = vsel %vm521_vm3, %v2231_v22, -inf }
 0x15e   : > { %v810_v38 = vmax.f32 %v802_v23, %v809_v32 }
 0x15f   : > { %v804_v50 = vmax.f32 %v796_v41, %v803_v46  ;;  %v825_v46 = vsel %vm521_vm3, %v2217_v15, -inf }
 0x162   : > { %v2250_v30 = vpop.f32.mrf.mxu3  ;;  %v1382_v31 = vpop.f32.mrf.mxu2 }
 0x163   : > { %v1383_v33 = vadd.f32 %v1382_v31, %v1340_v63  ;;  %v2254_v34 = vpop.f32.mrf.mxu0  ;;  %v2256_v35 = vpop.f32.mrf.mxu1  ;;  %v812_v63 = vmax.f32 %v804_v50, %v811_v60  ;;  %v821_v31 = vsel %vm521_vm3, %v2201_v7, -inf }
 0x164   : > { %v797_v37 = vsel %vm521_vm3, %v2254_v34, -inf  ;;  %v813_v61 = vsel %vm521_vm3, %v2256_v35, -inf }
 0x165   : > { %1390 = vst.msk [vmem:[%s2238_s23 + $0x10] sm:$0xff] %vm521_vm3, %v1383_v33  ;;  %v798_v42 = vmax.f32 %v790_v39, %v797_v37  ;;  %v820_v33 = vmax.f32 %v812_v63, %v819_v29 }
 0x167   : > { %v806_v51 = vmax.f32 %v798_v42, %v805_v47  ;;  %v827_v42 = vsel %vm521_vm3, %v2190_v3, -inf }
 0x168   : > { %v828_v47 = vmax.f32 %v820_v33, %v827_v42 }
 0x169   : > { %v814_v6 = vmax.f32 %v806_v51, %v813_v61  ;;  %v833_v51 = vsel %vm521_vm3, %v2219_v16, -inf }
 0x16a   : > { %v2278_v52 = vpop.f32.mrf.mxu3  ;;  %v1385_v53 = vpop.f32.mrf.mxu2 }
 0x16b   : > { %v1386_v55 = vadd.f32 %v1385_v53, %v1345_v45  ;;  %v2280_v56 = vpop.f32.mrf.mxu1  ;;  %v822_v36 = vmax.f32 %v814_v6, %v821_v31  ;;  %v831_v45 = vsel %vm521_vm3, %v2211_v12, -inf  ;;  %v835_v53 = vsel %vm521_vm3, %v2225_v19, -inf }
 0x16c   : > { %v815_v58 = vsel %vm521_vm3, %v2280_v56, -inf  ;;  %v836_v60 = vmax.f32 %v828_v47, %v835_v53 }
 0x16d   : > { %1391 = vst.msk [vmem:[%s2238_s23 + $0x18] sm:$0xff] %vm521_vm3, %v1386_v55  ;;  %v816_v25 = vmax.f32 %v808_v59, %v815_v58  ;;  %v830_v48 = vmax.f32 %v822_v36, %v829_v43  ;;  %v839_v58 = vsel %vm521_vm3, %v2250_v30, -inf  ;;  %v841_v59 = vsel %vm521_vm3, %v2278_v52, -inf }
 0x16f   : > { %v824_v39 = vmax.f32 %v816_v25, %v823_v26  ;;  %v838_v62 = vmax.f32 %v830_v48, %v837_v54 }
 0x171   : > { %v832_v49 = vmax.f32 %v824_v39, %v831_v45 }
 0x172   : > { %v2302_v37 = vpop.f32.mrf.mxu3 }
 0x173   : > { %v2304_v40 = vpop.f32.mrf.mxu1  ;;  %v843_v55 = vsel %vm521_vm3, %v2302_v37, -inf  ;;  %v840_v63 = vmax.f32 %v832_v49, %v839_v58 }
 0x174   : > { %v817_v41 = vsel %vm521_vm3, %v2304_v40, -inf  ;;  %v844_v25 = vmax.f32 %v836_v60, %v843_v55 }
 0x175   : > { %v818_v44 = vmax.f32 %v810_v38, %v817_v41 }
 0x177   : > { %v826_v50 = vmax.f32 %v818_v44, %v825_v46 }
 0x179   : > { %v834_v57 = vmax.f32 %v826_v50, %v833_v51 }
 0x17a   : > { %v2328_v61 = vpop.f32.mrf.mxu3 }
 0x17b   : > { %v842_v6 = vmax.f32 %v834_v57, %v841_v59  ;;  %v845_v23 = vsel %vm521_vm3, %v2328_v61, -inf }
 0x17c   : > { %v846_v26 = vmax.f32 %v838_v62, %v845_v23 }
 0x17d   : > { %v847_v29 = vmax.f32 %v840_v63, %v842_v6 }
 0x17e   : > { %v848_v31 = vmax.f32 %v844_v25, %v846_v26 }
 0x180   : > { %v849_v32 = vmax.f32 %v847_v29, %v848_v31 }
 0x182   : > { %v850_v33 = vrot.slane %v849_v32, 4 }
 0x184   : > { %v851_v36 = vmax.f32 %v849_v32, %v850_v33 }
 0x186   : > { %v852_v38 = vrot.slane %v851_v36, 2 }
 0x188   : > { %v853_v39 = vmax.f32 %v851_v36, %v852_v38 }
 0x18a   : > { %v854_v41 = vrot.slane %v853_v39, 1 }
 0x18c   : > { %v2332_v42 = vmax.f32 %v853_v39, %v854_v41 }
 0x18e   : > { %v2336_v43 = vsub.f32 %v2184_v0, %v2332_v42  ;;  %v2340_v44 = vsub.f32 %v2196_v4, %v2332_v42  ;;  %v2344_v45 = vsub.f32 %v2205_v9, %v2332_v42  ;;  %v2348_v46 = vsub.f32 %v2213_v13, %v2332_v42 }
 0x18f   : > { %v2352_v47 = vsub.f32 %v2221_v17, %v2332_v42  ;;  %v2359_v4 = vsub.f32 %v2229_v21, %v2332_v42  ;;  %v2364_v13 = vsub.f32 %v2242_v27, %v2332_v42  ;;  %v2369_v50 = vsub.f32 %v2254_v34, %v2332_v42 }
 0x190   : > { %v888_v48 = vmul.f32 1.442695, %v2336_v43  ;;  %v890_v0 = vmul.f32 1.442695, %v2340_v44  ;;  %v892_v49 = vmul.f32 1.442695, %v2344_v45  ;;  %v2376_v53 = vsub.f32 %v2186_v1, %v2332_v42 }
 0x191   : > { %v894_v9 = vmul.f32 1.442695, %v2348_v46  ;;  %v896_v17 = vmul.f32 1.442695, %v2352_v47  ;;  %v898_v51 = vmul.f32 1.442695, %v2359_v4  ;;  %v2385_v34 = vsub.f32 %v2198_v5, %v2332_v42 }
 0x192   : > { %1802 = vpow2.f32 %v888_v48  ;;  %v900_v27 = vmul.f32 1.442695, %v2364_v13  ;;  %v902_v57 = vmul.f32 1.442695, %v2369_v50  ;;  %v2396_v60 = vsub.f32 %v2207_v10, %v2332_v42 }
 0x193   : > { %1804 = vpow2.f32 %v890_v0  ;;  %v904_v62 = vmul.f32 1.442695, %v2376_v53  ;;  %v2405_v23 = vsub.f32 %v2215_v14, %v2332_v42  ;;  %v906_v25 = vmul.f32 1.442695, %v2385_v34 }
 0x194   : > { %1806 = vpow2.f32 %v892_v49  ;;  %v2414_v31 = vsub.f32 %v2223_v18, %v2332_v42  ;;  %v908_v32 = vmul.f32 1.442695, %v2396_v60  ;;  %v2423_v38 = vsub.f32 %v2231_v22, %v2332_v42 }
 0x195   : > { %1808 = vpow2.f32 %v894_v9  ;;  %v910_v39 = vmul.f32 1.442695, %v2405_v23  ;;  %v2432_v0 = vsub.f32 %v2244_v28, %v2332_v42 }
 0x196   : > { %1810 = vpow2.f32 %v896_v17  ;;  %v912_v49 = vmul.f32 1.442695, %v2414_v31 }
 0x197   : > { %1812 = vpow2.f32 %v898_v51  ;;  %v2441_v51 = vsub.f32 %v2256_v35, %v2332_v42 }
 0x198   : > { %v2372_v21 = vpop.eup %1802  ;;  %1814 = vpow2.f32 %v900_v27  ;;  %v914_v27 = vmul.f32 1.442695, %v2423_v38 }
 0x199   : > { %v2379_v54 = vpop.eup %1804  ;;  %v952_v58 = vsel %vm521_vm3, %v2372_v21, 0.0  ;;  %1816 = vpow2.f32 %v902_v57 }
 0x19a   : > { %v2381_v55 = vpop.eup %1806  ;;  %v953_v1 = vsel %vm521_vm3, %v2379_v54, 0.0  ;;  %1818 = vpow2.f32 %v904_v62  ;;  %v916_v62 = vmul.f32 1.442695, %v2432_v0 }
 0x19b   : > { %v2392_v59 = vpop.eup %1808  ;;  %v954_v5 = vadd.f32 %v953_v1, %v952_v58  ;;  %v955_v63 = vsel %vm521_vm3, %v2381_v55, 0.0  ;;  %1820 = vpow2.f32 %v906_v25  ;;  %v2450_v1 = vsub.f32 %v2280_v56, %v2332_v42 }
 0x19c   : > { %v2401_v6 = vpop.eup %1810  ;;  %v957_v10 = vsel %vm521_vm3, %v2392_v59, 0.0  ;;  %1822 = vpow2.f32 %v908_v32  ;;  %v2459_v25 = vsub.f32 %v2304_v40, %v2332_v42 }
 0x19d   : > { %v956_v26 = vadd.f32 %v955_v63, %v954_v5  ;;  %v2410_v29 = vpop.eup %1812  ;;  %v959_v14 = vsel %vm521_vm3, %v2401_v6, 0.0  ;;  %1824 = vpow2.f32 %v910_v39 }
 0x19e   : > { %v2419_v36 = vpop.eup %1814  ;;  %v961_v18 = vsel %vm521_vm3, %v2410_v29, 0.0  ;;  %1826 = vpow2.f32 %v912_v49  ;;  %v922_v49 = vmul.f32 1.442695, %v2459_v25 }
 0x19f   : > { %v958_v33 = vadd.f32 %v957_v10, %v956_v26  ;;  %v2428_v48 = vpop.eup %1816  ;;  %v963_v22 = vsel %vm521_vm3, %v2419_v36, 0.0  ;;  %1828 = vpow2.f32 %v914_v27  ;;  %v918_v26 = vmul.f32 1.442695, %v2441_v51 }
 0x1a0   : > { %v2437_v17 = vpop.eup %1818  ;;  %v965_v28 = vsel %vm521_vm3, %v2428_v48, 0.0  ;;  %1830 = vpow2.f32 %v916_v62  ;;  %v2486_v27 = vsub.f32 %v2209_v11, %v2332_v42 }
 0x1a1   : > { %v960_v41 = vadd.f32 %v959_v14, %v958_v33  ;;  %v2446_v58 = vpop.eup %1820  ;;  %v967_v35 = vsel %vm521_vm3, %v2437_v17, 0.0  ;;  %v2468_v33 = vsub.f32 %v2188_v2, %v2332_v42  ;;  %v920_v14 = vmul.f32 1.442695, %v2450_v1 }
 0x1a2   : > { %v2455_v63 = vpop.eup %1822  ;;  %v969_v56 = vsel %vm521_vm3, %v2446_v58, 0.0  ;;  %1832 = vpow2.f32 %v918_v26 }
 0x1a3   : > { %v962_v9 = vadd.f32 %v961_v18, %v960_v41  ;;  %v2464_v32 = vpop.eup %1824  ;;  %v971_v40 = vsel %vm521_vm3, %v2455_v63, 0.0  ;;  %v2477_v18 = vsub.f32 %v2201_v7, %v2332_v42  ;;  %1834 = vpow2.f32 %v920_v14 }
 0x1a4   : > { %v2473_v41 = vpop.eup %1826  ;;  %v973_v2 = vsel %vm521_vm3, %v2464_v32, 0.0  ;;  %1836 = vpow2.f32 %v922_v49  ;;  %v928_v14 = vmul.f32 1.442695, %v2486_v27  ;;  %v2513_v49 = vsub.f32 %v2203_v8, %v2332_v42 }
 0x1a5   : > { %v964_v57 = vadd.f32 %v963_v22, %v962_v9  ;;  %v2482_v22 = vpop.eup %1828  ;;  %v975_v7 = vsel %vm521_vm3, %v2473_v41, 0.0 }
 0x1a6   : > { %v2491_v62 = vpop.eup %1830  ;;  %v977_v11 = vsel %vm521_vm3, %v2482_v22, 0.0  ;;  %2987 = vst [vmem:[#allocation8_spill] sm:$0xff] %v2513_v49 }
 0x1a7   : > { %v966_v5 = vadd.f32 %v965_v28, %v964_v57  ;;  %v924_v57 = vmul.f32 1.442695, %v2468_v33 }
 0x1a9   : > { %v968_v10 = vadd.f32 %v967_v35, %v966_v5  ;;  %v2495_v5 = vsub.f32 %v2217_v15, %v2332_v42  ;;  %v926_v35 = vmul.f32 1.442695, %v2477_v18  ;;  %1838 = vpow2.f32 %v924_v57 }
 0x1aa   : > { %v979_v15 = vsel %vm521_vm3, %v2491_v62, 0.0 }
 0x1ab   : > { %v970_v39 = vadd.f32 %v969_v56, %v968_v10  ;;  %2985 = vst [vmem:[#allocation6_spill] sm:$0xff] %v2495_v5  ;;  %v2500_v10 = vpop.eup %1832  ;;  %v2504_v56 = vsub.f32 %v2190_v3, %v2332_v42  ;;  %1840 = vpow2.f32 %v926_v35 }
 0x1ac   : > { %v981_v3 = vsel %vm521_vm3, %v2500_v10, 0.0  ;;  %1842 = vpow2.f32 %v928_v14 }
 0x1ad   : > { %v972_v9 = vadd.f32 %v971_v40, %v970_v39  ;;  %2986 = vst [vmem:[#allocation7_spill] sm:$0xff] %v2504_v56  ;;  %v2509_v40 = vpop.eup %1834 }
 0x1ae   : > { %v2518_v57 = vpop.eup %1836  ;;  %v983_v8 = vsel %vm521_vm3, %v2509_v40, 0.0 }
 0x1af   : > { %v974_v28 = vadd.f32 %v973_v2, %v972_v9  ;;  %v930_v9 = vmul.f32 1.442695, %v2495_v5  ;;  %v2527_v35 = vpop.eup %1838 }
 0x1b1   : > { %v976_v26 = vadd.f32 %v975_v7, %v974_v28  ;;  %v2522_v28 = vsub.f32 %v2211_v12, %v2332_v42  ;;  %v932_v7 = vmul.f32 1.442695, %v2504_v56  ;;  %1844 = vpow2.f32 %v930_v9  ;;  %v2536_v14 = vpop.eup %1840 }
 0x1b2   : > { %v985_v12 = vsel %vm521_vm3, %v2518_v57, 0.0  ;;  %v2545_v9 = vpop.eup %1842 }
 0x1b3   : > { %v978_v39 = vadd.f32 %v977_v11, %v976_v26  ;;  %2988 = vst [vmem:[#allocation9_spill] sm:$0xff] %v2522_v28  ;;  %v2531_v11 = vsub.f32 %v2219_v16, %v2332_v42  ;;  %1846 = vpow2.f32 %v932_v7  ;;  %v987_v16 = vsel %vm521_vm3, %v2527_v35, 0.0 }
 0x1b5   : > { %v980_v2 = vadd.f32 %v979_v15, %v978_v39  ;;  %2989 = vst [vmem:[#allocation10_spill] sm:$0xff] %v2531_v11  ;;  %v934_v39 = vmul.f32 1.442695, %v2513_v49 }
 0x1b7   : > { %v982_v26 = vadd.f32 %v981_v3, %v980_v2  ;;  %v2540_v2 = vsub.f32 %v2225_v19, %v2332_v42  ;;  %v936_v3 = vmul.f32 1.442695, %v2522_v28  ;;  %1848 = vpow2.f32 %v934_v39  ;;  %v2554_v7 = vpop.eup %1844 }
 0x1b8   : > { %v989_v19 = vsel %vm521_vm3, %v2536_v14, 0.0 }
 0x1b9   : > { %v984_v15 = vadd.f32 %v983_v8, %v982_v26  ;;  %2990 = vst [vmem:[#allocation11_spill] sm:$0xff] %v2540_v2  ;;  %v2549_v26 = vsub.f32 %v2240_v24, %v2332_v42  ;;  %v938_v8 = vmul.f32 1.442695, %v2531_v11  ;;  %1850 = vpow2.f32 %v936_v3  ;;  %v2563_v39 = vpop.eup %1846 }
 0x1ba   : > { %v991_v24 = vsel %vm521_vm3, %v2545_v9, 0.0 }
 0x1bb   : > { %v986_v20 = vadd.f32 %v985_v12, %v984_v15  ;;  %2991 = vst [vmem:[#allocation12_spill] sm:$0xff] %v2549_v26  ;;  %v2558_v15 = vsub.f32 %v2250_v30, %v2332_v42  ;;  %v940_v12 = vmul.f32 1.442695, %v2540_v2  ;;  %1852 = vpow2.f32 %v938_v8 }
 0x1bc   : > { %v993_v30 = vsel %vm521_vm3, %v2554_v7, 0.0 }
 0x1bd   : > { %v988_v49 = vadd.f32 %v987_v16, %v986_v20  ;;  %2992 = vst [vmem:[#allocation13_spill] sm:$0xff] %v2558_v15  ;;  %v2567_v20 = vsub.f32 %v2278_v52, %v2332_v42  ;;  %v942_v16 = vmul.f32 1.442695, %v2549_v26  ;;  %v2572_v3 = vpop.eup %1848  ;;  %1854 = vpow2.f32 %v940_v12 }
 0x1be   : > { %2994 = vst [vmem:[#allocation15_spill] sm:$0xff] %v2572_v3  ;;  %v995_v52 = vsel %vm521_vm3, %v2563_v39, 0.0 }
 0x1bf   : > { %v990_v28 = vadd.f32 %v989_v19, %v988_v49  ;;  %2993 = vst [vmem:[#allocation14_spill] sm:$0xff] %v2567_v20  ;;  %v2576_v49 = vsub.f32 %v2302_v37, %v2332_v42  ;;  %v944_v19 = vmul.f32 1.442695, %v2558_v15  ;;  %v2581_v8 = vpop.eup %1850  ;;  %1856 = vpow2.f32 %v942_v16 }
 0x1c0   : > { %v997_v37 = vsel %vm521_vm3, %v2572_v3, 0.0  ;;  %v999_v15 = vsel %vm521_vm3, %v2581_v8, 0.0 }
 0x1c1   : > { %v992_v11 = vadd.f32 %v991_v24, %v990_v28  ;;  %2995 = vst [vmem:[#allocation16_spill] sm:$0xff] %v2576_v49  ;;  %v2585_v28 = vsub.f32 %v2328_v61, %v2332_v42  ;;  %v946_v24 = vmul.f32 1.442695, %v2567_v20  ;;  %v2590_v12 = vpop.eup %1852  ;;  %1858 = vpow2.f32 %v944_v19 }
 0x1c2   : > { %2997 = vst [vmem:[#allocation18_spill] sm:$0xff] %v2590_v12 }
 0x1c3   : > { %v994_v2 = vadd.f32 %v993_v30, %v992_v11  ;;  %2996 = vst [vmem:[#allocation17_spill] sm:$0xff] %v2585_v28  ;;  %v948_v11 = vmul.f32 1.442695, %v2576_v49  ;;  %v2595_v56 = vpop.eup %1854  ;;  %1860 = vpow2.f32 %v946_v24  ;;  %v950_v61 = vmul.f32 1.442695, %v2585_v28 }
 0x1c4   : > { %2998 = vst [vmem:[#allocation19_spill] sm:$0xff] %v2595_v56  ;;  %v1003_v19 = vsel %vm521_vm3, %v2595_v56, 0.0 }
 0x1c5   : > { %v996_v26 = vadd.f32 %v995_v52, %v994_v2  ;;  %v1001_v2 = vsel %vm521_vm3, %v2590_v12, 0.0  ;;  %v2600_v16 = vpop.eup %1856  ;;  %1862 = vpow2.f32 %v948_v11 }
 0x1c6   : > { %1864 = vpow2.f32 %v950_v61 }
 0x1c7   : > { %v998_v30 = vadd.f32 %v997_v37, %v996_v26  ;;  %v1323_v26 = vld [vmem:[%s2950_s5] sm:$0xff]  ;;  %v2607_v37 = vpop.eup %1858 }
 0x1c8   : > { %2999 = vst [vmem:[#allocation20_spill] sm:$0xff] %v2607_v37  ;;  %1329 = vperm.xlu2 %1800, %v1323_v26   ;;  %v1007_v11 = vsel %vm521_vm3, %v2607_v37, 0.0 }
 0x1c9   : > { %v1000_v42 = vadd.f32 %v999_v15, %v998_v30  ;;  %v1005_v15 = vsel %vm521_vm3, %v2600_v16, 0.0  ;;  %v2611_v30 = vpop.eup %1860 }
 0x1ca   : > { %3000 = vst [vmem:[#allocation21_spill] sm:$0xff] %v2611_v30  ;;  %v1009_v49 = vsel %vm521_vm3, %v2611_v30, 0.0 }
 0x1cb   : > { %v1002_v52 = vadd.f32 %v1001_v2, %v1000_v42  ;;  %v2615_v42 = vpop.eup %1862 }
 0x1cc   : > { %v1865_v20 = vpop.eup %1864  ;;  %v1011_v61 = vsel %vm521_vm3, %v2615_v42, 0.0 }
 0x1cd   : > { %v1004_v24 = vadd.f32 %v1003_v19, %v1002_v52  ;;  %v1013_v19 = vsel %vm521_vm3, %v1865_v20, 0.0 }
 0x1cf   : > { %v1006_v28 = vadd.f32 %v1005_v15, %v1004_v24 }
 0x1d1   : > { %v1008_v2 = vadd.f32 %v1007_v11, %v1006_v28 }
 0x1d3   : > { %v1010_v56 = vadd.f32 %v1009_v49, %v1008_v2 }
 0x1d5   : > { %v1012_v52 = vadd.f32 %v1011_v61, %v1010_v56 }
 0x1d7   : > { %v1014_v26 = vadd.f32 %v1013_v19, %v1012_v52 }
 0x1d9   : > { %v1015_v12 = vrot.slane %v1014_v26, 4 }
 0x1db   : > { %v1016_v24 = vadd.f32 %v1015_v12, %v1014_v26 }
 0x1dd   : > { %v1017_v15 = vrot.slane %v1016_v24, 2 }
 0x1df   : > { %v1018_v3 = vadd.f32 %v1017_v15, %v1016_v24 }
 0x1e1   : > { %v1019_v37 = vrot.slane %v1018_v3, 1 }
 0x1e3   : > { %v2622_v5 = vadd.f32 %v1019_v37, %v1018_v3 }
 0x1e5   : > { %1866 = vrcp.f32 %v2622_v5  ;;  %v1032_v2 = vand.u32 2147483648, %v2622_v5  ;;  %v1030_v56 = vand.u32 2147483647, %v2622_v5  ;;  %vm1026_vm9 = vweird.f32 %v2622_v5 }
 0x1e6   : > { %1868 = vlog2.f32 %v2622_v5 }
 0x1e7   : > { %v1033_v12 = vor.u32 1.1754944e-38, %v1032_v2  ;;  %vm1031_vm11 = vcmp.eq.f32.partialorder %v1030_v56, 8.507059e+37 }
 0x1eb   : > { %v1867_v28 = vpop.eup %1866 }
 0x1ec   : > { %v1022_v11 = vmul.f32 %v1867_v28, %v2622_v5  ;;  %vm1027_vm8 = vweird.f32 %v1867_v28 }
 0x1ed   : > { %vm1028_vm10 = vmor %vm1026_vm9, %vm1027_vm8 }
 0x1ee   : > { %v1023_v49 = vsub.f32 1.0, %v1022_v11 }
 0x1f0   : > { %v1024_v30 = vmul.f32 %v1867_v28, %v1023_v49 }
 0x1f2   : > { %v1025_v61 = vadd.f32 %v1867_v28, %v1024_v30 }
 0x1f4   : > { %v1029_v52 = vsel %vm1028_vm10, %v1867_v28, %v1025_v61 }
 0x1f5   : > { %v2629_v3 = vsel %vm1031_vm11, %v1033_v12, %v1029_v52 }
 0x1f6   : > { %v2632_v37 = vmul.f32 %v1865_v20, %v2629_v3  ;;  %v1038_v19 = vmul.f32 %v2381_v55, %v2629_v3  ;;  %v1036_v26 = vmul.f32 %v2372_v21, %v2629_v3  ;;  %v1039_v30 = vmul.f32 %v2392_v59, %v2629_v3 }
 0x1f7   : > { %v1037_v55 = vmul.f32 %v2379_v54, %v2629_v3  ;;  %v2648_v21 = vmul.f32 %v2500_v10, %v2629_v3  ;;  %v1040_v2 = vmul.f32 %v2401_v6, %v2629_v3  ;;  %v1042_v6 = vmul.f32 %v2419_v36, %v2629_v3 }
 0x1f8   : > { %v1196_v24 = vsel %vm521_vm3, %v1038_v19, 0.0  ;;  %v1190_v15 = vsel %vm521_vm3, %v1036_v26, 0.0  ;;  %v1070_v28 = vmul.f32 %v1036_v26, %v2336_v43  ;;  %v1199_v20 = vsel %vm521_vm3, %v1039_v30, 0.0 }
 0x1f9   : > { %1197 = vadd.xlane.f32.xlu0 %v1196_v24  ;;  %1191 = vadd.xlane.f32.xlu2 %v1190_v15  ;;  %v1072_v59 = vmul.f32 %v1038_v19, %v2344_v45  ;;  %v1071_v49 = vmul.f32 %v1037_v55, %v2340_v44  ;;  %v1041_v43 = vmul.f32 %v2410_v29, %v2629_v3  ;;  %v1235_v10 = vsel %vm521_vm3, %v2648_v21, 0.0 }
 0x1fa   : > { %1200 = vadd.xlane.f32.xlu1 %v1199_v20  ;;  %v1102_v11 = vsel %vm521_vm3, %v1070_v28, 0.0  ;;  %v1073_v56 = vmul.f32 %v1039_v30, %v2348_v46  ;;  %v1193_v61 = vsel %vm521_vm3, %v1037_v55, 0.0  ;;  %v1074_v44 = vmul.f32 %v1040_v2, %v2352_v47 }
 0x1fb   : > { %v1103_v54 = vsel %vm521_vm3, %v1071_v49, 0.0  ;;  %v1105_v12 = vsel %vm521_vm3, %v1072_v59, 0.0  ;;  %v1205_v46 = vsel %vm521_vm3, %v1041_v43, 0.0  ;;  %v1043_v52 = vmul.f32 %v2428_v48, %v2629_v3 }
 0x1fc   : > { %v1104_v45 = vadd.f32 %v1103_v54, %v1102_v11  ;;  %v1107_v19 = vsel %vm521_vm3, %v1073_v56, 0.0  ;;  %v1075_v26 = vmul.f32 %v1041_v43, %v2359_v4  ;;  %v2673_v30 = vmul.f32 %v2527_v35, %v2629_v3 }
 0x1fd   : > { %v1109_v47 = vsel %vm521_vm3, %v1074_v44, 0.0  ;;  %v1076_v36 = vmul.f32 %v1042_v6, %v2364_v13  ;;  %v1044_v15 = vmul.f32 %v2437_v17, %v2629_v3  ;;  %v1077_v48 = vmul.f32 %v1043_v52, %v2369_v50 }
 0x1fe   : > { %v1106_v29 = vadd.f32 %v1105_v12, %v1104_v45  ;;  %v1111_v20 = vsel %vm521_vm3, %v1075_v26, 0.0  ;;  %v1045_v4 = vmul.f32 %v2446_v58, %v2629_v3  ;;  %v1244_v35 = vsel %vm521_vm3, %v2673_v30, 0.0 }
 0x1ff   : > { %v1202_v55 = vsel %vm521_vm3, %v1040_v2, 0.0  ;;  %v1113_v13 = vsel %vm521_vm3, %v1076_v36, 0.0  ;;  %v1078_v17 = vmul.f32 %v1044_v15, %v2376_v53  ;;  %v1046_v50 = vmul.f32 %v2455_v63, %v2629_v3 }
 0x200   : > { %v1108_v24 = vadd.f32 %v1107_v19, %v1106_v29  ;;  %v1211_v11 = vsel %vm521_vm3, %v1043_v52, 0.0  ;;  %v1115_v58 = vsel %vm521_vm3, %v1077_v48, 0.0  ;;  %v1079_v43 = vmul.f32 %v1045_v4, %v2385_v34 }
 0x201   : > { %1236 = vadd.xlane.f32.xlu0 %v1235_v10  ;;  %1194 = vadd.xlane.f32.xlu2 %v1193_v61  ;;  %v1047_v2 = vmul.f32 %v2464_v32, %v2629_v3  ;;  %v1057_v56 = vmul.f32 %v2554_v7, %v2629_v3  ;;  %v1117_v53 = vsel %vm521_vm3, %v1078_v17, 0.0  ;;  %v1080_v10 = vmul.f32 %v1046_v50, %v2396_v60 }
 0x202   : > { %1206 = vadd.xlane.f32.xlu1 %v1205_v46  ;;  %v1110_v28 = vadd.f32 %v1109_v47, %v1108_v24  ;;  %v2701_v63 = vmul.f32 %v2473_v41, %v2629_v3  ;;  %v1119_v45 = vsel %vm521_vm3, %v1079_v43, 0.0  ;;  %v1049_v32 = vmul.f32 %v2482_v22, %v2629_v3  ;;  %v3001_v43 = vld [vmem:[#allocation6_spill] sm:$0xff] }
 0x203   : > { %v1081_v34 = vmul.f32 %v1047_v2, %v2405_v23  ;;  %v1253_v12 = vsel %vm521_vm3, %v1057_v56, 0.0  ;;  %v1208_v7 = vsel %vm521_vm3, %v1042_v6, 0.0  ;;  %v1121_v60 = vsel %vm521_vm3, %v1080_v10, 0.0  ;;  %v3003_v10 = vld [vmem:[#allocation7_spill] sm:$0xff] }
 0x204   : > { %v1112_v59 = vadd.f32 %v1111_v20, %v1110_v28  ;;  %v1082_v41 = vmul.f32 %v2701_v63, %v2414_v31  ;;  %v2714_v29 = vmul.f32 %v2491_v62, %v2629_v3  ;;  %v1217_v23 = vsel %vm521_vm3, %v1045_v4, 0.0 }
 0x205   : > { %v1123_v22 = vsel %vm521_vm3, %v1081_v34, 0.0  ;;  %v1083_v6 = vmul.f32 %v1049_v32, %v2423_v38  ;;  %v1060_v52 = vmul.f32 %v2581_v8, %v2629_v3  ;;  %v1052_v31 = vmul.f32 %v2509_v40, %v2629_v3 }
 0x206   : > { %v1114_v49 = vadd.f32 %v1113_v13, %v1112_v59  ;;  %v1125_v26 = vsel %vm521_vm3, %v1082_v41, 0.0  ;;  %v1084_v62 = vmul.f32 %v2714_v29, %v2432_v0  ;;  %v2728_v47 = vmul.f32 %v2518_v57, %v2629_v3 }
 0x207   : > { %v1085_v38 = vmul.f32 %v2648_v21, %v2441_v51  ;;  %v1127_v36 = vsel %vm521_vm3, %v1083_v6, 0.0  ;;  %v1262_v8 = vsel %vm521_vm3, %v1060_v52, 0.0  ;;  %v1214_v28 = vsel %vm521_vm3, %v1044_v15, 0.0 }
 0x208   : > { %v1116_v54 = vadd.f32 %v1115_v58, %v1114_v49  ;;  %v1086_v40 = vmul.f32 %v1052_v31, %v2450_v1  ;;  %v1129_v0 = vsel %vm521_vm3, %v1084_v62, 0.0  ;;  %v1223_v20 = vsel %vm521_vm3, %v1047_v2, 0.0 }
 0x209   : > { %1245 = vadd.xlane.f32.xlu0 %v1244_v35  ;;  %1203 = vadd.xlane.f32.xlu2 %v1202_v55  ;;  %v1087_v4 = vmul.f32 %v2728_v47, %v2459_v25  ;;  %v1131_v51 = vsel %vm521_vm3, %v1085_v38, 0.0  ;;  %v1055_v21 = vmul.f32 %v2536_v14, %v2629_v3  ;;  %v1063_v15 = vmul.f32 %v2600_v16, %v2629_v3 }
 0x20a   : > { %1212 = vadd.xlane.f32.xlu1 %v1211_v11  ;;  %v1118_v61 = vadd.f32 %v1117_v53, %v1116_v54  ;;  %v1088_v1 = vmul.f32 %v2673_v30, %v2468_v33  ;;  %v1133_v55 = vsel %vm521_vm3, %v1086_v40, 0.0  ;;  %v2750_v59 = vmul.f32 %v2545_v9, %v2629_v3 }
 0x20b   : > { %v1135_v13 = vsel %vm521_vm3, %v1087_v4, 0.0  ;;  %v1089_v17 = vmul.f32 %v1055_v21, %v2477_v18  ;;  %v1271_v14 = vsel %vm521_vm3, %v1063_v15, 0.0  ;;  %v1220_v11 = vsel %vm521_vm3, %v1046_v50, 0.0  ;;  %v3002_v50 = vld [vmem:[#allocation15_spill] sm:$0xff]  ;;  %v3012_v4 = vld [vmem:[#allocation21_spill] sm:$0xff] }
 0x20c   : > { %v1120_v44 = vadd.f32 %v1119_v45, %v1118_v61  ;;  %v1137_v49 = vsel %vm521_vm3, %v1088_v1, 0.0  ;;  %v1058_v33 = vmul.f32 %v2563_v39, %v2629_v3  ;;  %v1090_v9 = vmul.f32 %v2750_v59, %v2486_v27 }
 0x20d   : > { %v1229_v30 = vsel %vm521_vm3, %v1049_v32, 0.0  ;;  %v1091_v18 = vmul.f32 %v1057_v56, %v3001_v43  ;;  %v1139_v2 = vsel %vm521_vm3, %v1089_v17, 0.0  ;;  %v2766_v54 = vmul.f32 %v3002_v50, %v2629_v3  ;;  %v3004_v32 = vld [vmem:[#allocation5_spill] sm:$0xff] }
 0x20e   : > { %v1122_v46 = vadd.f32 %v1121_v60, %v1120_v44  ;;  %v1066_v53 = vmul.f32 %v2615_v42, %v2629_v3  ;;  %v1092_v61 = vmul.f32 %v1058_v33, %v3003_v10  ;;  %v1141_v27 = vsel %vm521_vm3, %v1090_v9, 0.0  ;;  %v3006_v60 = vld [vmem:[#allocation8_spill] sm:$0xff] }
 0x20f   : > { %v1143_v56 = vsel %vm521_vm3, %v1091_v18, 0.0  ;;  %v1093_v41 = vmul.f32 %v2766_v54, %v3006_v60  ;;  %v3017_v18 = vld [vmem:[#allocation17_spill] sm:$0xff] }
 0x210   : > { %v1124_v19 = vadd.f32 %v1123_v22, %v1122_v46  ;;  %v1280_v42 = vsel %vm521_vm3, %v1066_v53, 0.0  ;;  %v3007_v22 = vld [vmem:[#allocation9_spill] sm:$0xff] }
 0x211   : > { %1254 = vadd.xlane.f32.xlu0 %v1253_v12  ;;  %1209 = vadd.xlane.f32.xlu2 %v1208_v7  ;;  %v3005_v7 = vld [vmem:[#allocation18_spill] sm:$0xff]  ;;  %v1094_v6 = vmul.f32 %v1060_v52, %v3007_v22 }
 0x212   : > { %1218 = vadd.xlane.f32.xlu1 %v1217_v23  ;;  %v1126_v24 = vadd.f32 %v1125_v26, %v1124_v19  ;;  %v1061_v44 = vmul.f32 %v3005_v7, %v2629_v3  ;;  %v1226_v23 = vsel %vm521_vm3, %v2701_v63, 0.0  ;;  %v1145_v19 = vsel %vm521_vm3, %v1092_v61, 0.0  ;;  %v3008_v26 = vld [vmem:[#allocation19_spill] sm:$0xff]  ;;  %v1869_v7 = vpop.eup %1868 }
 0x213   : > { %v1062_v62 = vmul.f32 %v3008_v26, %v2629_v3  ;;  %v1147_v63 = vsel %vm521_vm3, %v1093_v41, 0.0  ;;  %v1149_v52 = vsel %vm521_vm3, %v1094_v6, 0.0  ;;  %v1256_v61 = vsel %vm521_vm3, %v1058_v33, 0.0 }
 0x214   : > { %v1128_v48 = vadd.f32 %v1127_v36, %v1126_v24  ;;  %v1238_v24 = vsel %vm521_vm3, %v1052_v31, 0.0  ;;  %v3009_v36 = vld [vmem:[#allocation10_spill] sm:$0xff]  ;;  %v3013_v31 = vld [vmem:[#allocation12_spill] sm:$0xff]  ;;  %v1259_v41 = vsel %vm521_vm3, %v2766_v54, 0.0 }
 0x216   : > { %v1130_v57 = vadd.f32 %v1129_v0, %v1128_v48  ;;  %v3010_v48 = vld [vmem:[#allocation20_spill] sm:$0xff]  ;;  %v3011_v0 = vld [vmem:[#allocation11_spill] sm:$0xff] }
 0x217   : > { %v1064_v40 = vmul.f32 %v3010_v48, %v2629_v3 }
 0x218   : > { %v1132_v35 = vadd.f32 %v1131_v51, %v1130_v57  ;;  %v2796_v51 = vmul.f32 %v3012_v4, %v2629_v3 }
 0x219   : > { %1263 = vadd.xlane.f32.xlu0 %v1262_v8  ;;  %1215 = vadd.xlane.f32.xlu2 %v1214_v28  ;;  %v1095_v8 = vmul.f32 %v1061_v44, %v3009_v36 }
 0x21a   : > { %1224 = vadd.xlane.f32.xlu1 %v1223_v20  ;;  %v1134_v25 = vadd.f32 %v1133_v55, %v1132_v35  ;;  %v1096_v20 = vmul.f32 %v1062_v62, %v3011_v0  ;;  %v1097_v35 = vmul.f32 %v1063_v15, %v3013_v31  ;;  %v1232_v55 = vsel %vm521_vm3, %v2714_v29, 0.0 }
 0x21b   : > { %v1151_v1 = vsel %vm521_vm3, %v1095_v8, 0.0 }
 0x21c   : > { %v1136_v16 = vadd.f32 %v1135_v13, %v1134_v25  ;;  %v3014_v13 = vld [vmem:[#allocation13_spill] sm:$0xff]  ;;  %v1155_v9 = vsel %vm521_vm3, %v1097_v35, 0.0 }
 0x21d   : > { %v1098_v17 = vmul.f32 %v1064_v40, %v3014_v13 }
 0x21e   : > { %v1138_v58 = vadd.f32 %v1137_v49, %v1136_v16  ;;  %v3015_v49 = vld [vmem:[#allocation14_spill] sm:$0xff] }
 0x21f   : > { %v1099_v3 = vmul.f32 %v2796_v51, %v3015_v49  ;;  %v1157_v29 = vsel %vm521_vm3, %v1098_v17, 0.0 }
 0x220   : > { %v1140_v39 = vadd.f32 %v1139_v2, %v1138_v58  ;;  %v1101_v2 = vmul.f32 %v2632_v37, %v3017_v18 }
 0x221   : > { %1272 = vadd.xlane.f32.xlu0 %v1271_v14  ;;  %1221 = vadd.xlane.f32.xlu2 %v1220_v11  ;;  %v1153_v14 = vsel %vm521_vm3, %v1096_v20, 0.0  ;;  %v1247_v11 = vsel %vm521_vm3, %v1055_v21, 0.0  ;;  %v1159_v50 = vsel %vm521_vm3, %v1099_v3, 0.0  ;;  %v1241_v21 = vsel %vm521_vm3, %v2728_v47, 0.0 }
 0x222   : > { %1230 = vadd.xlane.f32.xlu1 %v1229_v30  ;;  %v1330_v45 = vpop.permute.xlu2 %1329  ;;  %v1142_v34 = vadd.f32 %v1141_v27, %v1140_v39  ;;  %v3016_v30 = vld [vmem:[#allocation16_spill] sm:$0xff]  ;;  %v1265_v47 = vsel %vm521_vm3, %v1061_v44, 0.0  ;;  %v1268_v44 = vsel %vm521_vm3, %v1062_v62, 0.0 }
 0x223   : > { %v1377_v12 = vadd.f32 %v3004_v32, %v1330_v45  ;;  %v1100_v58 = vmul.f32 %v1066_v53, %v3016_v30  ;;  %v1163_v53 = vsel %vm521_vm3, %v1101_v2, 0.0 }
 0x224   : > { %v1144_v46 = vadd.f32 %v1143_v56, %v1142_v34  ;;  %v1250_v56 = vsel %vm521_vm3, %v2750_v59, 0.0  ;;  %v1274_v59 = vsel %vm521_vm3, %v1064_v40, 0.0 }
 0x225   : > { %1388 = vst.msk [vmem:[%s2238_s23] sm:$0xff] %vm521_vm3, %v1377_v12  ;;  %v1161_v10 = vsel %vm521_vm3, %v1100_v58, 0.0  ;;  %s1884_s23 = sshra.s32 %s1432_s24, 4  ;;  %s1885_s23 = int_to_ptr.hbm [resolvable:$true] %s1884_s23 }
 0x226   : > { %v1146_v38 = vadd.f32 %v1145_v19, %v1144_v46  ;;  %s1886_s26 = scalar_lea.hbm %s1885_s23, 1  ;;  %p1891_p1 = scmp.lt.s32.totalorder %s1885_s23, %s2953_s8 }
 0x227   : > { %p1887_p12 = scmp.ne.s32.totalorder %s1885_s23, %s1886_s26  ;;  %p1892_p2 = scmp.lt.s32.totalorder %s1890_s12, %s1886_s26 }
 0x228   : > { %v1148_v28 = vadd.f32 %v1147_v63, %v1146_v38 }
 0x229   : > { %1281 = vadd.xlane.f32.xlu0 %v1280_v42  ;;  %1227 = vadd.xlane.f32.xlu2 %v1226_v23  ;;  %v1069_v42 = vmul.f32 0.6931472, %v1869_v7  ;;  %p1888_p13 = pnand %p1887_p12, %p2052_p4  ;;  %p1893_p3 = por %p1892_p2, %p1891_p1 }
 0x22a   : > { %1239 = vadd.xlane.f32.xlu1 %v1238_v24  ;;  %v1150_v57 = vadd.f32 %v1149_v52, %v1148_v28 }
 0x22b   : > { %p1889_p0 = pneg %p1888_p13 }
 0x22c   : > { %v1152_v25 = vadd.f32 %v1151_v1, %v1150_v57 }
 0x22d   : > { %p1894_p5 = pnand %p1893_p3, %p1889_p0 }
 0x22e   : > { %v1154_v16 = vadd.f32 %v1153_v14, %v1152_v25 }
 0x230   : > { %v1156_v15 = vadd.f32 %v1155_v9, %v1154_v16 }
 0x231   : > { %1233 = vadd.xlane.f32.xlu2 %v1232_v55 }
 0x232   : > { %1248 = vadd.xlane.f32.xlu1 %v1247_v11  ;;  %v1158_v43 = vadd.f32 %v1157_v29, %v1156_v15 }
 0x234   : > { %v1160_v39 = vadd.f32 %v1159_v50, %v1158_v43 }
 0x236   : > { %v1162_v27 = vadd.f32 %v1161_v10, %v1160_v39 }
 0x238   : > { %v1164_v45 = vadd.f32 %v1163_v53, %v1162_v27 }
 0x239   : > { %1242 = vadd.xlane.f32.xlu2 %v1241_v21 }
 0x23a   : > { %1257 = vadd.xlane.f32.xlu1 %v1256_v61  ;;  %v1165_v34 = vrot.slane %v1164_v45, 4 }
 0x23c   : > { %v1166_v32 = vadd.f32 %v1165_v34, %v1164_v45 }
 0x23e   : > { %v1167_v12 = vrot.slane %v1166_v32, 2 }
 0x240   : > { %v1168_v33 = vadd.f32 %v1167_v12, %v1166_v32 }
 0x241   : > { %1251 = vadd.xlane.f32.xlu2 %v1250_v56 }
 0x242   : > { %1266 = vadd.xlane.f32.xlu1 %v1265_v47  ;;  %v1169_v60 = vrot.slane %v1168_v33, 1 }
 0x244   : > { %v1170_v5 = vadd.f32 %v1169_v60, %v1168_v33 }
 0x246   : > { %v1171_v23 = vsub.f32 %v1069_v42, %v1170_v5 }
 0x248   : > { %v1181_v54 = vsel %vm521_vm3, %v1171_v23, 0.0 }
 0x249   : > { %1260 = vadd.xlane.f32.xlu2 %v1259_v41 }
 0x24a   : > { %1275 = vadd.xlane.f32.xlu1 %v1274_v59 }
 0x251   : > { %1269 = vadd.xlane.f32.xlu2 %v1268_v44 }
 0x252   : > { %1897 = shalt.err (!%p1894_p5)
}
 0x253   : > { %1742 = dma.vmem_to_hbm [thread:$0]  (%p2052_p4), %s1430_s28, 16, %s1432_s24, %s1401_s16   ;;  %1182 = vadd.xlane.f32.xlu1 %v1181_v54  ;;  %v1277_v46 = vsel %vm521_vm3, %v2796_v51, 0.0  ;;  %v1283_v22 = vsel %vm521_vm3, %v2632_v37, 0.0  ;;  %vm1286_vm12 = vcmask 7168  }
 0x254   : > { %s1717_s1 = sshll.u32 %s2072_s14, 8  ;;  %s459_s24 = scalar_lea.vmem %s2954_s9, %s2072_s14 }
 0x255   : > { %s2852_s26 = scalar_lea.vmem %s2955_s10, %s1717_s1 }
 0x259   : > { %1278 = vadd.xlane.f32.xlu2 %v1277_v46 }
 0x25b   : > { %1284 = vadd.xlane.f32.xlu1 %v1283_v22 }
 0x26c   : > { %v1198_v6 = vpop.xlane.xlu0 %1197  ;;  %v1192_v19 = vpop.xlane.xlu2 %1191 }
 0x26d   : > { %1289 = vst.msk [vmem:[%s2852_s26 + $0x10] sm:$0xff] %vm1286_vm12, %v1198_v6  ;;  %v1201_v37 = vpop.xlane.xlu1 %1200 }
 0x26e   : > { %1287 = vst.msk [vmem:[%s2852_s26] sm:$0xff] %vm1286_vm12, %v1192_v19 }
 0x26f   : > { %1290 = vst.msk [vmem:[%s2852_s26 + $0x18] sm:$0xff] %vm1286_vm12, %v1201_v37 }
 0x274   : > { %v1237_v26 = vpop.xlane.xlu0 %1236  ;;  %v1195_v62 = vpop.xlane.xlu2 %1194 }
 0x275   : > { %1302 = vst.msk [vmem:[%s2852_s26 + $0x78] sm:$0xff] %vm1286_vm12, %v1237_v26  ;;  %v1207_v24 = vpop.xlane.xlu1 %1206 }
 0x276   : > { %1288 = vst.msk [vmem:[%s2852_s26 + $0x8] sm:$0xff] %vm1286_vm12, %v1195_v62 }
 0x277   : > { %1292 = vst.msk [vmem:[%s2852_s26 + $0x28] sm:$0xff] %vm1286_vm12, %v1207_v24 }
 0x27c   : > { %v1246_v38 = vpop.xlane.xlu0 %1245  ;;  %v1204_v36 = vpop.xlane.xlu2 %1203 }
 0x27d   : > { %1305 = vst.msk [vmem:[%s2852_s26 + $0x90] sm:$0xff] %vm1286_vm12, %v1246_v38  ;;  %v1213_v8 = vpop.xlane.xlu1 %1212 }
 0x27e   : > { %1291 = vst.msk [vmem:[%s2852_s26 + $0x20] sm:$0xff] %vm1286_vm12, %v1204_v36 }
 0x27f   : > { %1294 = vst.msk [vmem:[%s2852_s26 + $0x38] sm:$0xff] %vm1286_vm12, %v1213_v8 }
 0x284   : > { %v1255_v63 = vpop.xlane.xlu0 %1254  ;;  %v1210_v28 = vpop.xlane.xlu2 %1209 }
 0x285   : > { %1308 = vst.msk [vmem:[%s2852_s26 + $0xa8] sm:$0xff] %vm1286_vm12, %v1255_v63  ;;  %v1219_v52 = vpop.xlane.xlu1 %1218 }
 0x286   : > { %1293 = vst.msk [vmem:[%s2852_s26 + $0x30] sm:$0xff] %vm1286_vm12, %v1210_v28 }
 0x287   : > { %1296 = vst.msk [vmem:[%s2852_s26 + $0x48] sm:$0xff] %vm1286_vm12, %v1219_v52 }
 0x28c   : > { %v1264_v48 = vpop.xlane.xlu0 %1263  ;;  %v1216_v40 = vpop.xlane.xlu2 %1215 }
 0x28d   : > { %1311 = vst.msk [vmem:[%s2852_s26 + $0xc0] sm:$0xff] %vm1286_vm12, %v1264_v48  ;;  %v1225_v0 = vpop.xlane.xlu1 %1224 }
 0x28e   : > { %1295 = vst.msk [vmem:[%s2852_s26 + $0x40] sm:$0xff] %vm1286_vm12, %v1216_v40 }
 0x28f   : > { %1298 = vst.msk [vmem:[%s2852_s26 + $0x58] sm:$0xff] %vm1286_vm12, %v1225_v0 }
 0x294   : > { %v1273_v20 = vpop.xlane.xlu0 %1272  ;;  %v1222_v57 = vpop.xlane.xlu2 %1221 }
 0x295   : > { %1314 = vst.msk [vmem:[%s2852_s26 + $0xd8] sm:$0xff] %vm1286_vm12, %v1273_v20  ;;  %v1231_v4 = vpop.xlane.xlu1 %1230 }
 0x296   : > { %1297 = vst.msk [vmem:[%s2852_s26 + $0x50] sm:$0xff] %vm1286_vm12, %v1222_v57 }
 0x297   : > { %1300 = vst.msk [vmem:[%s2852_s26 + $0x68] sm:$0xff] %vm1286_vm12, %v1231_v4 }
 0x29c   : > { %v1282_v51 = vpop.xlane.xlu0 %1281  ;;  %v1228_v31 = vpop.xlane.xlu2 %1227 }
 0x29d   : > { %1317 = vst.msk [vmem:[%s2852_s26 + $0xf0] sm:$0xff] %vm1286_vm12, %v1282_v51  ;;  %v1240_v35 = vpop.xlane.xlu1 %1239 }
 0x29e   : > { %1299 = vst.msk [vmem:[%s2852_s26 + $0x60] sm:$0xff] %vm1286_vm12, %v1228_v31 }
 0x29f   : > { %1303 = vst.msk [vmem:[%s2852_s26 + $0x80] sm:$0xff] %vm1286_vm12, %v1240_v35 }
 0x2a4   : > { %v1234_v1 = vpop.xlane.xlu2 %1233 }
 0x2a5   : > { %1301 = vst.msk [vmem:[%s2852_s26 + $0x70] sm:$0xff] %vm1286_vm12, %v1234_v1  ;;  %v1249_v55 = vpop.xlane.xlu1 %1248 }
 0x2a6   : > { %1306 = vst.msk [vmem:[%s2852_s26 + $0x98] sm:$0xff] %vm1286_vm12, %v1249_v55 }
 0x2ac   : > { %v1243_v25 = vpop.xlane.xlu2 %1242 }
 0x2ad   : > { %1304 = vst.msk [vmem:[%s2852_s26 + $0x88] sm:$0xff] %vm1286_vm12, %v1243_v25  ;;  %v1258_v13 = vpop.xlane.xlu1 %1257 }
 0x2ae   : > { %1309 = vst.msk [vmem:[%s2852_s26 + $0xb0] sm:$0xff] %vm1286_vm12, %v1258_v13 }
 0x2b4   : > { %v1252_v17 = vpop.xlane.xlu2 %1251 }
 0x2b5   : > { %1307 = vst.msk [vmem:[%s2852_s26 + $0xa0] sm:$0xff] %vm1286_vm12, %v1252_v17  ;;  %v1267_v14 = vpop.xlane.xlu1 %1266 }
 0x2b6   : > { %1312 = vst.msk [vmem:[%s2852_s26 + $0xc8] sm:$0xff] %vm1286_vm12, %v1267_v14 }
 0x2bc   : > { %v1261_v11 = vpop.xlane.xlu2 %1260 }
 0x2bd   : > { %1310 = vst.msk [vmem:[%s2852_s26 + $0xb8] sm:$0xff] %vm1286_vm12, %v1261_v11  ;;  %v1276_v16 = vpop.xlane.xlu1 %1275 }
 0x2be   : > { %1315 = vst.msk [vmem:[%s2852_s26 + $0xe0] sm:$0xff] %vm1286_vm12, %v1276_v16 }
 0x2c4   : > { %v1270_v49 = vpop.xlane.xlu2 %1269 }
 0x2c5   : > { %1313 = vst.msk [vmem:[%s2852_s26 + $0xd0] sm:$0xff] %vm1286_vm12, %v1270_v49 }
 0x2c6   : > { %v1183_v3 = vpop.xlane.xlu1 %1182 }
 0x2c7   : > { %1185 = vst.msk [vmem:[%s459_s24] sm:$0x1] %vm1184_vm7, %v1183_v3 }
 0x2cc   : > { %v1279_v9 = vpop.xlane.xlu2 %1278 }
 0x2cd   : > { %1316 = vst.msk [vmem:[%s2852_s26 + $0xe8] sm:$0xff] %vm1286_vm12, %v1279_v9 }
 0x2ce   : > { %v1285_v15 = vpop.xlane.xlu1 %1284 }
 0x2cf   : > { %1318 = vst.msk [vmem:[%s2852_s26 + $0xf8] sm:$0xff] %vm1286_vm12, %v1285_v15 }
 0x2d0 PF: > { %p1748_p4 = scmp.ge.s32.totalorder %s1948_s22, 2  ;;  %s1466_s16 = sand.u32 1, %s1928_s17  }
 0x2d1   : > { %s1467_s14 = scalar_lea.sflag [#allocation3], %s1466_s16 }
 0x2d2   : > { %p1745_p6 = pnand %p1748_p4, %p2059_p8 }
 0x2d4   : > { %p1746_p7 = pneg %p1745_p6 }
 0x2d6   : > { %1923 = dma.done.wait (%p1746_p7), %s1467_s14, 16  }
 0x2d7   : > { %1925 = vsyncadd (%p1746_p7), %s1467_s14, 4294967280  ;;  %s25_s22 = sadd.s32 1, %s1948_s22   ;;  %s3019_s17 = smov %s1932_s18 }
 0x2d8   : > { %p22_p9 = scmp.ge.s32.totalorder %s25_s22, 4   ;;  %s3020_s18 = smov %s1936_s19 }
 0x2d9   : > { %s3021_s19 = smov %s2065_s30  ;;  %s3022_s20 = smov %s1944_s21 }
 0x2da   : > { %s3023_s21 = smov %s3025_s25  ;;  %24 = sbr.rel (!%p22_p9) target bundleno = 8 (0x8), region = 131 }
 0x2df   :  { %1495 = vsyncpa [#allocation3], 1 }
 0x2e0   :  { %1497 = vsyncpa [#allocation3 + $0x1], 1 }

</bundles_post_ra>
